<compile_context>
chip_gen: v6e
topology: v6e:2x2x1
jax: 0.10.0
libtpu: 0.0.40
codegen_flags: <defaults>
</compile_context>

<pallas_src>
import functools

import jax
import jax.numpy as jnp
from jax.experimental import pallas as pl
from jax.experimental.pallas import tpu as pltpu

LANES = 128                      # pad Cout to a multiple of this (lane-dense stores)
NEG_SLOPE = 0.2
VMEM_LIMIT = 32 * 1024 * 1024    # explicit scoped-VMEM limit (safe on v5e/v6e/v7x)


# ----------------------------- Pallas kernels ------------------------------ #

def _conv_kernel(x_ref, w_ref, b_ref, o_ref, stats_ref=None, *, act, with_stats):
    """bf16 (TM, K) x (K, Cp) matmul, f32 accumulate, + bias (+ activation).

    If with_stats, also writes per-tile [sum; sum_of_squares] over the M rows
    of the (pre-activation) f32 accumulator -> (1, 2, Cp) stats block.
    """
    acc = jnp.dot(x_ref[...], w_ref[...], preferred_element_type=jnp.float32)
    acc = acc + b_ref[...]
    if with_stats:  # stats are over the pre-activation conv output (BatchNorm input)
        s = jnp.sum(acc, axis=0, keepdims=True)          # (1, Cp)
        ss = jnp.sum(acc * acc, axis=0, keepdims=True)   # (1, Cp)
        stats_ref[0] = jnp.concatenate([s, ss], axis=0)  # (2, Cp)
    if act == "leaky_relu":
        acc = jnp.where(acc >= 0, acc, NEG_SLOPE * acc)
    o_ref[...] = acc.astype(o_ref.dtype)


def _bn_lrelu_kernel(x_ref, scale_ref, shift_ref, o_ref):
    """Per-channel scale/shift (folded BatchNorm) + LeakyReLU(0.2), f32 math."""
    y = x_ref[...] * scale_ref[...] + shift_ref[...]
    o_ref[...] = jnp.where(y >= 0, y, NEG_SLOPE * y).astype(o_ref.dtype)


# ------------------------------ kernel wrappers ----------------------------- #

def _pick_tm(m):
    """Largest tile that divides M exactly, preferring >= 2 grid steps."""
    for t in (512, 256, 128, 64, 32, 16, 8):
        if m % t == 0 and m // t >= 2:
            return t
    return m


def _compiler_params():
    return pltpu.CompilerParams(
        dimension_semantics=("parallel",),
        vmem_limit_bytes=VMEM_LIMIT,
    )


def _conv_matmul(patches_bf16, w_mat, b_pad, *, act="none", with_stats=False,
                 out_dtype=jnp.float32):
    """patches: (M, K) bf16, w_mat: (K, Cp) bf16, b_pad: (1, Cp) f32."""
    M, K = patches_bf16.shape
    Cp = w_mat.shape[1]
    tm = _pick_tm(M)
    grid = (M // tm,)

    out_shape = [jax.ShapeDtypeStruct((M, Cp), out_dtype)]
    out_specs = [pl.BlockSpec((tm, Cp), lambda i: (i, 0))]
    if with_stats:
        out_shape.append(jax.ShapeDtypeStruct((grid[0], 2, Cp), jnp.float32))
        out_specs.append(pl.BlockSpec((1, 2, Cp), lambda i: (i, 0, 0)))

    res = pl.pallas_call(
        functools.partial(_conv_kernel, act=act, with_stats=with_stats),
        out_shape=tuple(out_shape),
        grid_spec=pltpu.PrefetchScalarGridSpec(
            num_scalar_prefetch=0,
            grid=grid,
            in_specs=[
                pl.BlockSpec((tm, K), lambda i: (i, 0)),
                pl.BlockSpec((K, Cp), lambda i: (0, 0)),
                pl.BlockSpec((1, Cp), lambda i: (0, 0)),
            ],
            out_specs=tuple(out_specs),
        ),
        compiler_params=_compiler_params(),
    )(patches_bf16, w_mat, b_pad)
    return res if with_stats else res[0]


def _bn_lrelu(y, scale, shift, out_dtype=jnp.bfloat16):
    """y: (M, Cp) f32; scale/shift: (1, Cp) f32 -> (M, Cp) out_dtype."""
    M, Cp = y.shape
    tm = _pick_tm(M)
    return pl.pallas_call(
        _bn_lrelu_kernel,
        out_shape=jax.ShapeDtypeStruct((M, Cp), out_dtype),
        grid_spec=pltpu.PrefetchScalarGridSpec(
            num_scalar_prefetch=0,
            grid=(M // tm,),
            in_specs=[
                pl.BlockSpec((tm, Cp), lambda i: (i, 0)),
                pl.BlockSpec((1, Cp), lambda i: (0, 0)),
                pl.BlockSpec((1, Cp), lambda i: (0, 0)),
            ],
            out_specs=pl.BlockSpec((tm, Cp), lambda i: (i, 0)),
        ),
        compiler_params=_compiler_params(),
    )(y, scale, shift)


# -------------------------------- conv glue --------------------------------- #

def _im2col(x_nhwc, k, stride, pad):
    """(kh, kw, cin)-ordered patches -> ((N*OH*OW, k*k*C), OH, OW)."""
    N, H, W, C = x_nhwc.shape
    if pad:
        x_nhwc = jnp.pad(x_nhwc, ((0, 0), (pad, pad), (pad, pad), (0, 0)))
    OH = (H + 2 * pad - k) // stride + 1
    OW = (W + 2 * pad - k) // stride + 1
    cols = [
        x_nhwc[:, i:i + stride * OH:stride, j:j + stride * OW:stride, :]
        for i in range(k) for j in range(k)
    ]
    patches = jnp.concatenate(cols, axis=-1)       # (N, OH, OW, k*k*C)
    return patches.reshape(N * OH * OW, k * k * C), OH, OW


def _conv_lrelu_layer(x_nhwc, w_mat, b_pad, cout, stride, pad):
    N = x_nhwc.shape[0]
    cp = w_mat.shape[1]
    patches, OH, OW = _im2col(x_nhwc, 4, stride, pad)
    y = _conv_matmul(patches.astype(jnp.bfloat16), w_mat, b_pad,
                     act="leaky_relu", out_dtype=jnp.bfloat16)
    return y.reshape(N, OH, OW, cp)[..., :cout]


def _conv_bn_lrelu_layer(x_nhwc, w_mat, b_pad, gamma_pad, beta_pad, cout, stride,
                         pad, eps=1e-5):
    N = x_nhwc.shape[0]
    cp = w_mat.shape[1]
    patches, OH, OW = _im2col(x_nhwc, 4, stride, pad)
    y, stats = _conv_matmul(patches.astype(jnp.bfloat16), w_mat, b_pad,
                            act="none", with_stats=True, out_dtype=jnp.float32)
    M = y.shape[0]
    totals = jnp.sum(stats, axis=0)                              # (2, cp)
    mean = totals[0] / M
    var = jnp.maximum(totals[1] / M - mean * mean, 0.0)          # biased var (PyTorch training BN)
    scale = gamma_pad / jnp.sqrt(var + eps)
    shift = beta_pad - mean * scale
    z = _bn_lrelu(y, scale.reshape(1, cp), shift.reshape(1, cp))
    return z.reshape(N, OH, OW, cp)[..., :cout]


# ----------------------------- Discriminator -------------------------------- #

def init_discriminator_params(key, pic_dim, cond_dim, d, mean=0.0, std=0.02):
    ks = jax.random.split(key, 4)
    def w(k, cout, cin):
        return mean + std * jax.random.normal(k, (cout, cin, 4, 4), jnp.float32)
    return {
        "conv1_w": w(ks[0], d, pic_dim + cond_dim), "conv1_b": jnp.zeros((d,), jnp.float32),
        "conv2_w": w(ks[1], d * 2, d),              "conv2_b": jnp.zeros((d * 2,), jnp.float32),
        "conv3_w": w(ks[2], d * 4, d * 2),          "conv3_b": jnp.zeros((d * 4,), jnp.float32),
        "conv4_w": w(ks[3], 1, d * 4),              "conv4_b": jnp.zeros((1,), jnp.float32),
        "bn2_gamma": jnp.ones((d * 2,), jnp.float32), "bn2_beta": jnp.zeros((d * 2,), jnp.float32),
        "bn3_gamma": jnp.ones((d * 4,), jnp.float32), "bn3_beta": jnp.zeros((d * 4,), jnp.float32),
    }


def _round_up(n, m):
    return ((n + m - 1) // m) * m


def _prep_conv(w_oihw, b):
    cout, cin, kh, kw = w_oihw.shape
    cp = _round_up(cout, LANES)
    w_mat = jnp.transpose(w_oihw, (2, 3, 1, 0)).reshape(kh * kw * cin, cout)
    w_mat = jnp.pad(w_mat, ((0, 0), (0, cp - cout))).astype(jnp.bfloat16)
    b_pad = jnp.pad(b, (0, cp - cout)).astype(jnp.float32).reshape(1, cp)
    return w_mat, b_pad


def _pad_vec(v, cp):
    return jnp.pad(v.astype(jnp.float32), (0, cp - v.shape[0]))


def prepare_discriminator_params(params):
    """One-time (outside jit) conversion of OIHW weights into kernel layout."""
    w1, b1 = _prep_conv(params["conv1_w"], params["conv1_b"])
    w2, b2 = _prep_conv(params["conv2_w"], params["conv2_b"])
    w3, b3 = _prep_conv(params["conv3_w"], params["conv3_b"])
    cout4, cin4, kh4, kw4 = params["conv4_w"].shape
    w4 = jnp.transpose(params["conv4_w"], (2, 3, 1, 0)).reshape(kh4 * kw4 * cin4, cout4)
    return {
        "w1": w1, "b1": b1,
        "w2": w2, "b2": b2,
        "g2": _pad_vec(params["bn2_gamma"], w2.shape[1]),
        "be2": _pad_vec(params["bn2_beta"], w2.shape[1]),
        "w3": w3, "b3": b3,
        "g3": _pad_vec(params["bn3_gamma"], w3.shape[1]),
        "be3": _pad_vec(params["bn3_beta"], w3.shape[1]),
        "w4": w4.astype(jnp.float32), "b4": params["conv4_b"].astype(jnp.float32),
    }


def discriminator_forward(prep, image_nchw, label_nchw, *, channels):
    c1, c2, c3 = channels

    # torch.cat([input, label], 1), then NCHW -> NHWC (internal layout), bf16.
    x = jnp.concatenate([image_nchw, label_nchw], axis=1)
    x = jnp.transpose(x, (0, 2, 3, 1)).astype(jnp.bfloat16)

    # conv1 + leaky_relu(0.2)
    x = _conv_lrelu_layer(x, prep["w1"], prep["b1"], c1, stride=2, pad=1)

    # conv2 + BN(batch stats) + leaky_relu(0.2)
    x = _conv_bn_lrelu_layer(x, prep["w2"], prep["b2"], prep["g2"], prep["be2"],
                             c2, stride=2, pad=1)

    # conv3 + BN(batch stats) + leaky_relu(0.2)
    x = _conv_bn_lrelu_layer(x, prep["w3"], prep["b3"], prep["g3"], prep["be3"],
                             c3, stride=2, pad=1)

    # conv4 (k=4, s=1, p=0, Cout=1) + sigmoid: tiny GEMV; plain jnp.dot per
    # the perf review (a Pallas call here would be pure launch/pad overhead).
    N = x.shape[0]
    patches, OH, OW = _im2col(x, 4, 1, 0)
    logits = patches.astype(jnp.float32) @ prep["w4"] + prep["b4"]
    y = jax.nn.sigmoid(logits).reshape(N, OH, OW, 1)
    return jnp.transpose(y, (0, 3, 1, 2))          # back to NCHW: (N, 1, 1, 1)


if __name__ == "__main__":
    # DCGAN-consistent shapes: 32x32 input so conv4 reduces 4x4 -> 1x1.
    N, PIC_DIM, COND_DIM, D, H, W = 2, 1, 3, 16, 32, 32

    key = jax.random.PRNGKey(0)
    k_img, k_lab, k_par = jax.random.split(key, 3)
    image = jax.random.normal(k_img, (N, PIC_DIM, H, W), jnp.float32)
    label = jax.random.normal(k_lab, (N, COND_DIM, H, W), jnp.float32)

    params = init_discriminator_params(k_par, PIC_DIM, COND_DIM, D)
    prep = prepare_discriminator_params(params)    # weight prep hoisted out of jit

    fwd = jax.jit(functools.partial(discriminator_forward,
                                    channels=(D, 2 * D, 4 * D)))
    out = fwd(prep, image, label)
    jax.block_until_ready(out)

    assert out.shape == (N, 1, 1, 1), out.shape
    assert bool(jnp.all((out >= 0.0) & (out <= 1.0)))
    print("KERNEL_OK")
</pallas_src>

<mosaic_0001>
module attributes {stable_mosaic.version = 11 : i64} {
  func.func @_conv_kernel(%arg0: i32, %arg1: memref<256x64xbf16, #tpu.memory_space<vmem>>, %arg2: memref<64x128xbf16, #tpu.memory_space<vmem>>, %arg3: memref<1x128xf32, #tpu.memory_space<vmem>>, %arg4: memref<256x128xbf16, #tpu.memory_space<vmem>>) attributes {dimension_semantics = [#tpu.dimension_semantics<parallel>], iteration_bounds = array<i64: 2>, scalar_prefetch = 0 : i64, scratch_operands = 0 : i64, tpu.core_type = #tpu.core_type<tc>, window_params = [{transform_indices = @transform_0, window_bounds = array<i64: 256, 64>}, {pipeline_mode = #tpu.pipeline_mode<synchronous>, transform_indices = @transform_1, window_bounds = array<i64: 64, 128>}, {pipeline_mode = #tpu.pipeline_mode<synchronous>, transform_indices = @transform_2, window_bounds = array<i64: 1, 128>}, {transform_indices = @transform_3, window_bounds = array<i64: 256, 128>}]} {
    %c0 = arith.constant 0 : index
    %c0_0 = arith.constant 0 : index
    %0 = vector.load %arg1[%c0, %c0_0] : memref<256x64xbf16, #tpu.memory_space<vmem>>, vector<256x64xbf16>
    %c0_1 = arith.constant 0 : index
    %c0_2 = arith.constant 0 : index
    %1 = vector.load %arg2[%c0_1, %c0_2] : memref<64x128xbf16, #tpu.memory_space<vmem>>, vector<64x128xbf16>
    %cst = arith.constant dense<0.000000e+00> : vector<256x128xf32>
    %2 = tpu.matmul %0, %1, %cst {dimension_numbers = #tpu.dot_dimension_numbers<[1], [0], [0], [1], [0, 0, 1, 1], [], []>} : vector<256x64xbf16>, vector<64x128xbf16>, vector<256x128xf32> -> vector<256x128xf32>
    %c0_3 = arith.constant 0 : index
    %c0_4 = arith.constant 0 : index
    %3 = vector.load %arg3[%c0_3, %c0_4] : memref<1x128xf32, #tpu.memory_space<vmem>>, vector<1x128xf32>
    %4 = vector.broadcast %3 : vector<1x128xf32> to vector<256x128xf32>
    %5 = arith.addf %2, %4 : vector<256x128xf32>
    %cst_5 = arith.constant 0.000000e+00 : f32
    %6 = vector.broadcast %cst_5 : f32 to vector<256x128xf32>
    %7 = arith.cmpf oge, %5, %6 : vector<256x128xf32>
    %cst_6 = arith.constant 2.000000e-01 : f32
    %8 = vector.broadcast %cst_6 : f32 to vector<256x128xf32>
    %9 = arith.mulf %8, %5 : vector<256x128xf32>
    %10 = arith.select %7, %5, %9 : vector<256x128xi1>, vector<256x128xf32>
    %11 = arith.truncf %10 : vector<256x128xf32> to vector<256x128xbf16>
    %c0_7 = arith.constant 0 : index
    %c0_8 = arith.constant 0 : index
    %12 = vector.load %arg4[%c0_7, %c0_8] : memref<256x128xbf16, #tpu.memory_space<vmem>>, vector<256x128xbf16>
    tpu.vector_store %arg4[%c0_7, %c0_8], %11 {strides = array<i32>} : memref<256x128xbf16, #tpu.memory_space<vmem>>, vector<256x128xbf16>,
    return
  }
  func.func @transform_0(%arg0: i32) -> (i32, i32) {
    %c0_i32 = arith.constant 0 : i32
    %c0_i32_0 = arith.constant 0 : i32
    return %arg0, %c0_i32 : i32, i32
  }
  func.func @transform_1(%arg0: i32) -> (i32, i32) {
    %c0_i32 = arith.constant 0 : i32
    %c0_i32_0 = arith.constant 0 : i32
    %c0_i32_1 = arith.constant 0 : i32
    return %c0_i32, %c0_i32_0 : i32, i32
  }
  func.func @transform_2(%arg0: i32) -> (i32, i32) {
    %c0_i32 = arith.constant 0 : i32
    %c0_i32_0 = arith.constant 0 : i32
    %c0_i32_1 = arith.constant 0 : i32
    return %c0_i32, %c0_i32_0 : i32, i32
  }
  func.func @transform_3(%arg0: i32) -> (i32, i32) {
    %c0_i32 = arith.constant 0 : i32
    %c0_i32_0 = arith.constant 0 : i32
    return %arg0, %c0_i32 : i32, i32
  }
}

module attributes {stable_mosaic.version = 11 : i64} {
  func.func @_conv_kernel(%arg0: i32, %arg1: memref<64x256xbf16, #tpu.memory_space<vmem>>, %arg2: memref<256x128xbf16, #tpu.memory_space<vmem>>, %arg3: memref<1x128xf32, #tpu.memory_space<vmem>>, %arg4: memref<64x128xf32, #tpu.memory_space<vmem>>, %arg5: memref<1x2x128xf32, #tpu.memory_space<vmem>>) attributes {dimension_semantics = [#tpu.dimension_semantics<parallel>], iteration_bounds = array<i64: 2>, scalar_prefetch = 0 : i64, scratch_operands = 0 : i64, tpu.core_type = #tpu.core_type<tc>, window_params = [{transform_indices = @transform_0, window_bounds = array<i64: 64, 256>}, {pipeline_mode = #tpu.pipeline_mode<synchronous>, transform_indices = @transform_1, window_bounds = array<i64: 256, 128>}, {pipeline_mode = #tpu.pipeline_mode<synchronous>, transform_indices = @transform_2, window_bounds = array<i64: 1, 128>}, {transform_indices = @transform_3, window_bounds = array<i64: 64, 128>}, {transform_indices = @transform_4, window_bounds = array<i64: 1, 2, 128>}]} {
    %c0 = arith.constant 0 : index
    %c0_0 = arith.constant 0 : index
    %0 = vector.load %arg1[%c0, %c0_0] : memref<64x256xbf16, #tpu.memory_space<vmem>>, vector<64x256xbf16>
    %c0_1 = arith.constant 0 : index
    %c0_2 = arith.constant 0 : index
    %1 = vector.load %arg2[%c0_1, %c0_2] : memref<256x128xbf16, #tpu.memory_space<vmem>>, vector<256x128xbf16>
    %cst = arith.constant dense<0.000000e+00> : vector<64x128xf32>
    %2 = tpu.matmul %0, %1, %cst {dimension_numbers = #tpu.dot_dimension_numbers<[1], [0], [0], [1], [0, 0, 1, 1], [], []>} : vector<64x256xbf16>, vector<256x128xbf16>, vector<64x128xf32> -> vector<64x128xf32>
    %c0_3 = arith.constant 0 : index
    %c0_4 = arith.constant 0 : index
    %3 = vector.load %arg3[%c0_3, %c0_4] : memref<1x128xf32, #tpu.memory_space<vmem>>, vector<1x128xf32>
    %4 = vector.broadcast %3 : vector<1x128xf32> to vector<64x128xf32>
    %5 = arith.addf %2, %4 : vector<64x128xf32>
    %cst_5 = arith.constant dense<0.000000e+00> : vector<128xf32>
    %6 = vector.multi_reduction <add>, %5, %cst_5 [0] : vector<64x128xf32> to vector<128xf32>
    %7 = vector.shape_cast %6 : vector<128xf32> to vector<1x128xf32>
    %8 = arith.mulf %5, %5 : vector<64x128xf32>
    %cst_6 = arith.constant dense<0.000000e+00> : vector<128xf32>
    %9 = vector.multi_reduction <add>, %8, %cst_6 [0] : vector<64x128xf32> to vector<128xf32>
    %10 = vector.shape_cast %9 : vector<128xf32> to vector<1x128xf32>
    %11 = tpu.concatenate %7, %10 in 0 : vector<1x128xf32>, vector<1x128xf32> -> vector<2x128xf32>
    %c0_7 = arith.constant 0 : index
    %c0_8 = arith.constant 0 : index
    %c0_9 = arith.constant 0 : index
    %12 = vector.load %arg5[%c0_7, %c0_8, %c0_9] : memref<1x2x128xf32, #tpu.memory_space<vmem>>, vector<1x2x128xf32>
    %13 = vector.shape_cast %12 : vector<1x2x128xf32> to vector<2x128xf32>
    %14 = vector.shape_cast %11 : vector<2x128xf32> to vector<1x2x128xf32>
    tpu.vector_store %arg5[%c0_7, %c0_8, %c0_9], %14 {strides = array<i32>} : memref<1x2x128xf32, #tpu.memory_space<vmem>>, vector<1x2x128xf32>,
    %c0_10 = arith.constant 0 : index
    %c0_11 = arith.constant 0 : index
    %15 = vector.load %arg4[%c0_10, %c0_11] : memref<64x128xf32, #tpu.memory_space<vmem>>, vector<64x128xf32>
    tpu.vector_store %arg4[%c0_10, %c0_11], %5 {strides = array<i32>} : memref<64x128xf32, #tpu.memory_space<vmem>>, vector<64x128xf32>,
    return
  }
  func.func @transform_0(%arg0: i32) -> (i32, i32) {
    %c0_i32 = arith.constant 0 : i32
    %c0_i32_0 = arith.constant 0 : i32
    return %arg0, %c0_i32 : i32, i32
  }
  func.func @transform_1(%arg0: i32) -> (i32, i32) {
    %c0_i32 = arith.constant 0 : i32
    %c0_i32_0 = arith.constant 0 : i32
    %c0_i32_1 = arith.constant 0 : i32
    return %c0_i32, %c0_i32_0 : i32, i32
  }
  func.func @transform_2(%arg0: i32) -> (i32, i32) {
    %c0_i32 = arith.constant 0 : i32
    %c0_i32_0 = arith.constant 0 : i32
    %c0_i32_1 = arith.constant 0 : i32
    return %c0_i32, %c0_i32_0 : i32, i32
  }
  func.func @transform_3(%arg0: i32) -> (i32, i32) {
    %c0_i32 = arith.constant 0 : i32
    %c0_i32_0 = arith.constant 0 : i32
    return %arg0, %c0_i32 : i32, i32
  }
  func.func @transform_4(%arg0: i32) -> (i32, i32, i32) {
    %c0_i32 = arith.constant 0 : i32
    %c0_i32_0 = arith.constant 0 : i32
    %c0_i32_1 = arith.constant 0 : i32
    return %arg0, %c0_i32, %c0_i32_0 : i32, i32, i32
  }
}

module attributes {stable_mosaic.version = 11 : i64} {
  func.func @_bn_lrelu_kernel(%arg0: i32, %arg1: memref<64x128xf32, #tpu.memory_space<vmem>>, %arg2: memref<1x128xf32, #tpu.memory_space<vmem>>, %arg3: memref<1x128xf32, #tpu.memory_space<vmem>>, %arg4: memref<64x128xbf16, #tpu.memory_space<vmem>>) attributes {dimension_semantics = [#tpu.dimension_semantics<parallel>], iteration_bounds = array<i64: 2>, scalar_prefetch = 0 : i64, scratch_operands = 0 : i64, tpu.core_type = #tpu.core_type<tc>, window_params = [{transform_indices = @transform_0, window_bounds = array<i64: 64, 128>}, {pipeline_mode = #tpu.pipeline_mode<synchronous>, transform_indices = @transform_1, window_bounds = array<i64: 1, 128>}, {pipeline_mode = #tpu.pipeline_mode<synchronous>, transform_indices = @transform_2, window_bounds = array<i64: 1, 128>}, {transform_indices = @transform_3, window_bounds = array<i64: 64, 128>}]} {
    %c0 = arith.constant 0 : index
    %c0_0 = arith.constant 0 : index
    %0 = vector.load %arg1[%c0, %c0_0] : memref<64x128xf32, #tpu.memory_space<vmem>>, vector<64x128xf32>
    %c0_1 = arith.constant 0 : index
    %c0_2 = arith.constant 0 : index
    %1 = vector.load %arg2[%c0_1, %c0_2] : memref<1x128xf32, #tpu.memory_space<vmem>>, vector<1x128xf32>
    %2 = vector.broadcast %1 : vector<1x128xf32> to vector<64x128xf32>
    %3 = arith.mulf %0, %2 : vector<64x128xf32>
    %c0_3 = arith.constant 0 : index
    %c0_4 = arith.constant 0 : index
    %4 = vector.load %arg3[%c0_3, %c0_4] : memref<1x128xf32, #tpu.memory_space<vmem>>, vector<1x128xf32>
    %5 = vector.broadcast %4 : vector<1x128xf32> to vector<64x128xf32>
    %6 = arith.addf %3, %5 : vector<64x128xf32>
    %cst = arith.constant 0.000000e+00 : f32
    %7 = vector.broadcast %cst : f32 to vector<64x128xf32>
    %8 = arith.cmpf oge, %6, %7 : vector<64x128xf32>
    %cst_5 = arith.constant 2.000000e-01 : f32
    %9 = vector.broadcast %cst_5 : f32 to vector<64x128xf32>
    %10 = arith.mulf %9, %6 : vector<64x128xf32>
    %11 = arith.select %8, %6, %10 : vector<64x128xi1>, vector<64x128xf32>
    %12 = arith.truncf %11 : vector<64x128xf32> to vector<64x128xbf16>
    %c0_6 = arith.constant 0 : index
    %c0_7 = arith.constant 0 : index
    %13 = vector.load %arg4[%c0_6, %c0_7] : memref<64x128xbf16, #tpu.memory_space<vmem>>, vector<64x128xbf16>
    tpu.vector_store %arg4[%c0_6, %c0_7], %12 {strides = array<i32>} : memref<64x128xbf16, #tpu.memory_space<vmem>>, vector<64x128xbf16>,
    return
  }
  func.func @transform_0(%arg0: i32) -> (i32, i32) {
    %c0_i32 = arith.constant 0 : i32
    %c0_i32_0 = arith.constant 0 : i32
    return %arg0, %c0_i32 : i32, i32
  }
  func.func @transform_1(%arg0: i32) -> (i32, i32) {
    %c0_i32 = arith.constant 0 : i32
    %c0_i32_0 = arith.constant 0 : i32
    %c0_i32_1 = arith.constant 0 : i32
    return %c0_i32, %c0_i32_0 : i32, i32
  }
  func.func @transform_2(%arg0: i32) -> (i32, i32) {
    %c0_i32 = arith.constant 0 : i32
    %c0_i32_0 = arith.constant 0 : i32
    %c0_i32_1 = arith.constant 0 : i32
    return %c0_i32, %c0_i32_0 : i32, i32
  }
  func.func @transform_3(%arg0: i32) -> (i32, i32) {
    %c0_i32 = arith.constant 0 : i32
    %c0_i32_0 = arith.constant 0 : i32
    return %arg0, %c0_i32 : i32, i32
  }
}

module attributes {stable_mosaic.version = 11 : i64} {
  func.func @_bn_lrelu_kernel(%arg0: i32, %arg1: memref<16x128xf32, #tpu.memory_space<vmem>>, %arg2: memref<1x128xf32, #tpu.memory_space<vmem>>, %arg3: memref<1x128xf32, #tpu.memory_space<vmem>>, %arg4: memref<16x128xbf16, #tpu.memory_space<vmem>>) attributes {dimension_semantics = [#tpu.dimension_semantics<parallel>], iteration_bounds = array<i64: 2>, scalar_prefetch = 0 : i64, scratch_operands = 0 : i64, tpu.core_type = #tpu.core_type<tc>, window_params = [{transform_indices = @transform_0, window_bounds = array<i64: 16, 128>}, {pipeline_mode = #tpu.pipeline_mode<synchronous>, transform_indices = @transform_1, window_bounds = array<i64: 1, 128>}, {pipeline_mode = #tpu.pipeline_mode<synchronous>, transform_indices = @transform_2, window_bounds = array<i64: 1, 128>}, {transform_indices = @transform_3, window_bounds = array<i64: 16, 128>}]} {
    %c0 = arith.constant 0 : index
    %c0_0 = arith.constant 0 : index
    %0 = vector.load %arg1[%c0, %c0_0] : memref<16x128xf32, #tpu.memory_space<vmem>>, vector<16x128xf32>
    %c0_1 = arith.constant 0 : index
    %c0_2 = arith.constant 0 : index
    %1 = vector.load %arg2[%c0_1, %c0_2] : memref<1x128xf32, #tpu.memory_space<vmem>>, vector<1x128xf32>
    %2 = vector.broadcast %1 : vector<1x128xf32> to vector<16x128xf32>
    %3 = arith.mulf %0, %2 : vector<16x128xf32>
    %c0_3 = arith.constant 0 : index
    %c0_4 = arith.constant 0 : index
    %4 = vector.load %arg3[%c0_3, %c0_4] : memref<1x128xf32, #tpu.memory_space<vmem>>, vector<1x128xf32>
    %5 = vector.broadcast %4 : vector<1x128xf32> to vector<16x128xf32>
    %6 = arith.addf %3, %5 : vector<16x128xf32>
    %cst = arith.constant 0.000000e+00 : f32
    %7 = vector.broadcast %cst : f32 to vector<16x128xf32>
    %8 = arith.cmpf oge, %6, %7 : vector<16x128xf32>
    %cst_5 = arith.constant 2.000000e-01 : f32
    %9 = vector.broadcast %cst_5 : f32 to vector<16x128xf32>
    %10 = arith.mulf %9, %6 : vector<16x128xf32>
    %11 = arith.select %8, %6, %10 : vector<16x128xi1>, vector<16x128xf32>
    %12 = arith.truncf %11 : vector<16x128xf32> to vector<16x128xbf16>
    %c0_6 = arith.constant 0 : index
    %c0_7 = arith.constant 0 : index
    %13 = vector.load %arg4[%c0_6, %c0_7] : memref<16x128xbf16, #tpu.memory_space<vmem>>, vector<16x128xbf16>
    tpu.vector_store %arg4[%c0_6, %c0_7], %12 {strides = array<i32>} : memref<16x128xbf16, #tpu.memory_space<vmem>>, vector<16x128xbf16>,
    return
  }
  func.func @transform_0(%arg0: i32) -> (i32, i32) {
    %c0_i32 = arith.constant 0 : i32
    %c0_i32_0 = arith.constant 0 : i32
    return %arg0, %c0_i32 : i32, i32
  }
  func.func @transform_1(%arg0: i32) -> (i32, i32) {
    %c0_i32 = arith.constant 0 : i32
    %c0_i32_0 = arith.constant 0 : i32
    %c0_i32_1 = arith.constant 0 : i32
    return %c0_i32, %c0_i32_0 : i32, i32
  }
  func.func @transform_2(%arg0: i32) -> (i32, i32) {
    %c0_i32 = arith.constant 0 : i32
    %c0_i32_0 = arith.constant 0 : i32
    %c0_i32_1 = arith.constant 0 : i32
    return %c0_i32, %c0_i32_0 : i32, i32
  }
  func.func @transform_3(%arg0: i32) -> (i32, i32) {
    %c0_i32 = arith.constant 0 : i32
    %c0_i32_0 = arith.constant 0 : i32
    return %arg0, %c0_i32 : i32, i32
  }
}

module attributes {stable_mosaic.version = 11 : i64} {
  func.func @_conv_kernel(%arg0: i32, %arg1: memref<16x512xbf16, #tpu.memory_space<vmem>>, %arg2: memref<512x128xbf16, #tpu.memory_space<vmem>>, %arg3: memref<1x128xf32, #tpu.memory_space<vmem>>, %arg4: memref<16x128xf32, #tpu.memory_space<vmem>>, %arg5: memref<1x2x128xf32, #tpu.memory_space<vmem>>) attributes {dimension_semantics = [#tpu.dimension_semantics<parallel>], iteration_bounds = array<i64: 2>, scalar_prefetch = 0 : i64, scratch_operands = 0 : i64, tpu.core_type = #tpu.core_type<tc>, window_params = [{transform_indices = @transform_0, window_bounds = array<i64: 16, 512>}, {pipeline_mode = #tpu.pipeline_mode<synchronous>, transform_indices = @transform_1, window_bounds = array<i64: 512, 128>}, {pipeline_mode = #tpu.pipeline_mode<synchronous>, transform_indices = @transform_2, window_bounds = array<i64: 1, 128>}, {transform_indices = @transform_3, window_bounds = array<i64: 16, 128>}, {transform_indices = @transform_4, window_bounds = array<i64: 1, 2, 128>}]} {
    %c0 = arith.constant 0 : index
    %c0_0 = arith.constant 0 : index
    %0 = vector.load %arg1[%c0, %c0_0] : memref<16x512xbf16, #tpu.memory_space<vmem>>, vector<16x512xbf16>
    %c0_1 = arith.constant 0 : index
    %c0_2 = arith.constant 0 : index
    %1 = vector.load %arg2[%c0_1, %c0_2] : memref<512x128xbf16, #tpu.memory_space<vmem>>, vector<512x128xbf16>
    %cst = arith.constant dense<0.000000e+00> : vector<16x128xf32>
    %2 = tpu.matmul %0, %1, %cst {dimension_numbers = #tpu.dot_dimension_numbers<[1], [0], [0], [1], [0, 0, 1, 1], [], []>} : vector<16x512xbf16>, vector<512x128xbf16>, vector<16x128xf32> -> vector<16x128xf32>
    %c0_3 = arith.constant 0 : index
    %c0_4 = arith.constant 0 : index
    %3 = vector.load %arg3[%c0_3, %c0_4] : memref<1x128xf32, #tpu.memory_space<vmem>>, vector<1x128xf32>
    %4 = vector.broadcast %3 : vector<1x128xf32> to vector<16x128xf32>
    %5 = arith.addf %2, %4 : vector<16x128xf32>
    %cst_5 = arith.constant dense<0.000000e+00> : vector<128xf32>
    %6 = vector.multi_reduction <add>, %5, %cst_5 [0] : vector<16x128xf32> to vector<128xf32>
    %7 = vector.shape_cast %6 : vector<128xf32> to vector<1x128xf32>
    %8 = arith.mulf %5, %5 : vector<16x128xf32>
    %cst_6 = arith.constant dense<0.000000e+00> : vector<128xf32>
    %9 = vector.multi_reduction <add>, %8, %cst_6 [0] : vector<16x128xf32> to vector<128xf32>
    %10 = vector.shape_cast %9 : vector<128xf32> to vector<1x128xf32>
    %11 = tpu.concatenate %7, %10 in 0 : vector<1x128xf32>, vector<1x128xf32> -> vector<2x128xf32>
    %c0_7 = arith.constant 0 : index
    %c0_8 = arith.constant 0 : index
    %c0_9 = arith.constant 0 : index
    %12 = vector.load %arg5[%c0_7, %c0_8, %c0_9] : memref<1x2x128xf32, #tpu.memory_space<vmem>>, vector<1x2x128xf32>
    %13 = vector.shape_cast %12 : vector<1x2x128xf32> to vector<2x128xf32>
    %14 = vector.shape_cast %11 : vector<2x128xf32> to vector<1x2x128xf32>
    tpu.vector_store %arg5[%c0_7, %c0_8, %c0_9], %14 {strides = array<i32>} : memref<1x2x128xf32, #tpu.memory_space<vmem>>, vector<1x2x128xf32>,
    %c0_10 = arith.constant 0 : index
    %c0_11 = arith.constant 0 : index
    %15 = vector.load %arg4[%c0_10, %c0_11] : memref<16x128xf32, #tpu.memory_space<vmem>>, vector<16x128xf32>
    tpu.vector_store %arg4[%c0_10, %c0_11], %5 {strides = array<i32>} : memref<16x128xf32, #tpu.memory_space<vmem>>, vector<16x128xf32>,
    return
  }
  func.func @transform_0(%arg0: i32) -> (i32, i32) {
    %c0_i32 = arith.constant 0 : i32
    %c0_i32_0 = arith.constant 0 : i32
    return %arg0, %c0_i32 : i32, i32
  }
  func.func @transform_1(%arg0: i32) -> (i32, i32) {
    %c0_i32 = arith.constant 0 : i32
    %c0_i32_0 = arith.constant 0 : i32
    %c0_i32_1 = arith.constant 0 : i32
    return %c0_i32, %c0_i32_0 : i32, i32
  }
  func.func @transform_2(%arg0: i32) -> (i32, i32) {
    %c0_i32 = arith.constant 0 : i32
    %c0_i32_0 = arith.constant 0 : i32
    %c0_i32_1 = arith.constant 0 : i32
    return %c0_i32, %c0_i32_0 : i32, i32
  }
  func.func @transform_3(%arg0: i32) -> (i32, i32) {
    %c0_i32 = arith.constant 0 : i32
    %c0_i32_0 = arith.constant 0 : i32
    return %arg0, %c0_i32 : i32, i32
  }
  func.func @transform_4(%arg0: i32) -> (i32, i32, i32) {
    %c0_i32 = arith.constant 0 : i32
    %c0_i32_0 = arith.constant 0 : i32
    %c0_i32_1 = arith.constant 0 : i32
    return %arg0, %c0_i32, %c0_i32_0 : i32, i32, i32
  }
}

</mosaic_0001>

<bundles_post_ra>
// kernel: discriminator_forward.5
= control target key start
LH: loop header
LB: loop body
LE: loop exit
PB: predicated region body
PF: predicated region fallthrough
CT: control target
= control target key end

     0   :  { %s1179_s12 = smov 0   ;;  %s1308_s0 = inlined_call_operand.vmem [shape: bf16[512,64], index: 0, kind: input, shape index: {}]   ;;  %s1309_s1 = inlined_call_operand.vmem [shape: bf16[64,128], index: 1, kind: input, shape index: {}]   ;;  %s1310_s2 = inlined_call_operand.vmem [shape: f32[1,128], index: 2, kind: input, shape index: {}]   ;;  %s1311_s3 = inlined_call_operand.vmem [shape: bf16[512,128], index: 3, kind: output, shape index: {}]  }
   0x1 LB: > { %s848_s13 = sadd.s32 4294967295, %s1157_s12   ;;  %p852_p0 = scmp.ge.s32.totalorder %s1157_s12, 1  ;;  %s1157_s12 = sphi %s1179_s12, %s13_s12  }
   0x2   : > { %p138_p1 = scmp.lt.s32.totalorder %s1157_s12, 3 }
   0x4   : > { %p139_p2 = pnand %p852_p0, %p138_p1 }
   0x5   : > { %s853_s16 = sshll.u32 (!%p139_p2), %s848_s13, 5 }
   0x6   : > { %142 = sbr.rel (%p139_p2) target bundleno = 263 (0x107), region = 32  ;;  %p163_p3 = scmp.lt.s32.totalorder (!%p139_p2), %s853_s16, 63 }
   0xb   : > { %v1131_v0 = vld [vmem:[%s1309_s1 + $0x18] sm:$0xff]   ;;  %v1132_v1 = vld [vmem:[%s1309_s1 + $0x10] sm:$0xff]   ;;  %s1313_s16 = smov (!%p163_p3, %s853_s16), 63  ;;  %v1133_v2 = vld [vmem:[%s1309_s1 + $0x8] sm:$0xff]   ;;  %vm326_vm0 = vcmask 523264  }
   0xc   : > { %1075 = vmatprep.subr.bf16.mxu0 %v1131_v0  ;;  %1115 = vmatprep.subr.bf16.mxu1 %v1131_v0  ;;  %s854_s21 = sshll.u32 %s1313_s16, 2  ;;  %v1134_v3 = vld [vmem:[%s1309_s1] sm:$0xff]  }
   0xd   : > { %1076 = vmatpush3.bf16.msra.mxu0 %v1131_v0  ;;  %1119 = vmatpush3.bf16.msra.mxu1 %v1131_v0  ;;  %s1207_s26 = scalar_lea.vmem %s1308_s0, %s854_s21  ;;  %v1244_v20 = vld [vmem:[%s1310_s2] ss:$0 sm:$0xff]  ;;  %s1259_s4 = scalar_lea.vmem %s1311_s3, %s854_s21 }
   0xe   : > { %1077 = vmatprep.subr.bf16.mxu0 %v1132_v1  ;;  %1116 = vmatprep.subr.bf16.mxu1 %v1132_v1  ;;  %v1135_v4 = vld [vmem:[%s1207_s26] sm:$0xff]   ;;  %v1137_v6 = vld [vmem:[%s1207_s26 + $0x8] sm:$0xff]   ;;  %v1139_v8 = vld [vmem:[%s1207_s26 + $0x10] sm:$0xff]  }
   0xf   : > { %v1136_v5 = vld [vmem:[%s1207_s26 + $0x40] sm:$0xff]   ;;  %1083 = vmatprep.mubr.msk.bf16.mxu0 %vm326_vm0, %v1135_v4  ;;  %v1138_v7 = vld [vmem:[%s1207_s26 + $0x48] sm:$0xff]   ;;  %v1140_v9 = vld [vmem:[%s1207_s26 + $0x50] sm:$0xff]  }
  0x10   : > { %1099 = vmatprep.mubr.msk.bf16.mxu1 %vm326_vm0, %v1136_v5  ;;  %v1141_v10 = vld [vmem:[%s1207_s26 + $0x18] sm:$0xff]   ;;  %v1143_v12 = vld [vmem:[%s1207_s26 + $0x20] sm:$0xff]   ;;  %v1145_v14 = vld [vmem:[%s1207_s26 + $0x28] sm:$0xff]  }
  0x11   : > { %1078 = vmatpush3.bf16.msra.mxu0 %v1132_v1  ;;  %1120 = vmatpush3.bf16.msra.mxu1 %v1132_v1  ;;  %v1142_v11 = vld [vmem:[%s1207_s26 + $0x58] sm:$0xff]   ;;  %v1144_v13 = vld [vmem:[%s1207_s26 + $0x60] sm:$0xff]   ;;  %v1146_v15 = vld [vmem:[%s1207_s26 + $0x68] sm:$0xff]  }
  0x12   : > { %1079 = vmatprep.subr.bf16.mxu0 %v1133_v2  ;;  %1117 = vmatprep.subr.bf16.mxu1 %v1133_v2  ;;  %v1147_v16 = vld [vmem:[%s1207_s26 + $0x30] sm:$0xff]   ;;  %v1149_v18 = vld [vmem:[%s1207_s26 + $0x38] sm:$0xff]  }
  0x13   : > { %v1148_v17 = vld [vmem:[%s1207_s26 + $0x70] sm:$0xff]   ;;  %v1150_v19 = vld [vmem:[%s1207_s26 + $0x78] sm:$0xff]  }
  0x15   : > { %1080 = vmatpush3.bf16.msra.mxu0 %v1133_v2  ;;  %1121 = vmatpush3.bf16.msra.mxu1 %v1133_v2 }
  0x16   : > { %1081 = vmatprep.subr.bf16.mxu0 %v1134_v3  ;;  %1118 = vmatprep.subr.bf16.mxu1 %v1134_v3 }
  0x19   : > { %1082 = vmatpush3.bf16.msra.mxu0 %v1134_v3  ;;  %1122 = vmatpush3.bf16.msra.mxu1 %v1134_v3 }
  0x1c   : > { %1084 = vmatmul.mubr.msk.bf16.vlgmr.msra.gmra.mxu0 %vm326_vm0, %v1137_v6  ;;  %1100 = vmatmul.mubr.msk.bf16.vlgmr.msra.gmra.mxu1 %vm326_vm0, %v1138_v7 }
  0x1d   : > { %1087 = vmatprep.mubr.msk.bf16.mxu0 %vm326_vm0, %v1139_v8  ;;  %1103 = vmatprep.mubr.msk.bf16.mxu1 %vm326_vm0, %v1140_v9 }
  0x24   : > { %1088 = vmatmul.mubr.msk.bf16.gmra.mxu0 %vm326_vm0, %v1141_v10  ;;  %1104 = vmatmul.mubr.msk.bf16.gmra.mxu1 %vm326_vm0, %v1142_v11 }
  0x25   : > { %1091 = vmatprep.mubr.msk.bf16.mxu0 %vm326_vm0, %v1143_v12  ;;  %1107 = vmatprep.mubr.msk.bf16.mxu1 %vm326_vm0, %v1144_v13 }
  0x2c   : > { %1092 = vmatmul.mubr.msk.bf16.gmra.mxu0 %vm326_vm0, %v1145_v14  ;;  %1108 = vmatmul.mubr.msk.bf16.gmra.mxu1 %vm326_vm0, %v1146_v15 }
  0x2d   : > { %1095 = vmatprep.mubr.msk.bf16.mxu0 %vm326_vm0, %v1147_v16  ;;  %1111 = vmatprep.mubr.msk.bf16.mxu1 %vm326_vm0, %v1148_v17 }
  0x34   : > { %1096 = vmatmul.mubr.msk.bf16.gmra.mxu0 %vm326_vm0, %v1149_v18  ;;  %1112 = vmatmul.mubr.msk.bf16.gmra.mxu1 %vm326_vm0, %v1150_v19 }
  0xdc   : > { %v1085_v21 = vpop.f32.mrf.mxu0  ;;  %v1101_v22 = vpop.f32.mrf.mxu1 }
  0xdd   : > { %v418_v23 = vadd.f32 %v1085_v21, %v1244_v20  ;;  %v482_v24 = vadd.f32 %v1101_v22, %v1244_v20 }
  0xde   : > { %v409_v25 = vpop.f32.mrf.mxu0  ;;  %v473_v26 = vpop.f32.mrf.mxu1 }
  0xdf   : > { %vm538_vm1 = vcmp.ge.f32.partialorder %v418_v23, 0.0  ;;  %v570_v27 = vmul.f32 0.2, %v418_v23  ;;  %vm554_vm2 = vcmp.ge.f32.partialorder %v482_v24, 0.0  ;;  %v586_v28 = vmul.f32 0.2, %v482_v24 }
  0xe0   : > { %v410_v29 = vadd.f32 %v1244_v20, %v409_v25  ;;  %v474_v30 = vadd.f32 %v1244_v20, %v473_v26  ;;  %v1086_v31 = vpop.f32.mrf.mxu0  ;;  %v1102_v32 = vpop.f32.mrf.mxu1 }
  0xe1   : > { %v602_v33 = vsel %vm538_vm1, %v418_v23, %v570_v27  ;;  %v421_v34 = vadd.f32 %v1086_v31, %v1244_v20  ;;  %v485_v35 = vadd.f32 %v1102_v32, %v1244_v20  ;;  %v618_v36 = vsel %vm554_vm2, %v482_v24, %v586_v28 }
  0xe2   : > { %vm536_vm3 = vcmp.ge.f32.partialorder %v410_v29, 0.0  ;;  %v568_v37 = vmul.f32 0.2, %v410_v29  ;;  %vm552_vm4 = vcmp.ge.f32.partialorder %v474_v30, 0.0  ;;  %v412_v38 = vpop.f32.mrf.mxu0  ;;  %v476_v39 = vpop.f32.mrf.mxu1  ;;  %v584_v43 = vmul.f32 0.2, %v474_v30 }
  0xe3   : > { %vm539_vm5 = vcmp.ge.f32.partialorder %v421_v34, 0.0  ;;  %v571_v40 = vmul.f32 0.2, %v421_v34  ;;  %vm555_vm6 = vcmp.ge.f32.partialorder %v485_v35, 0.0  ;;  %v587_v41 = vmul.f32 0.2, %v485_v35 }
  0xe4   : > { %v600_v42 = vsel %vm536_vm3, %v410_v29, %v568_v37  ;;  %v413_v44 = vadd.f32 %v1244_v20, %v412_v38  ;;  %v477_v45 = vadd.f32 %v1244_v20, %v476_v39  ;;  %v1089_v46 = vpop.f32.mrf.mxu0  ;;  %v1105_v47 = vpop.f32.mrf.mxu1  ;;  %v616_v59 = vsel %vm552_vm4, %v474_v30, %v584_v43 }
  0xe5   : > { %v603_v48 = vsel %vm539_vm5, %v421_v34, %v571_v40  ;;  %v619_v49 = vsel %vm555_vm6, %v485_v35, %v587_v41  ;;  %v434_v50 = vadd.f32 %v1089_v46, %v1244_v20  ;;  %v498_v51 = vadd.f32 %v1105_v47, %v1244_v20 }
  0xe6   : > { %v968_v52 = vpack.c.bf16 %v603_v48, %v602_v33  ;;  %v1008_v53 = vpack.c.bf16 %v619_v49, %v618_v36  ;;  %vm537_vm7 = vcmp.ge.f32.partialorder %v413_v44, 0.0  ;;  %v569_v54 = vmul.f32 0.2, %v413_v44  ;;  %v425_v55 = vpop.f32.mrf.mxu0  ;;  %v489_v56 = vpop.f32.mrf.mxu1 }
  0xe7   : > { %vm553_vm8 = vcmp.ge.f32.partialorder %v477_v45, 0.0  ;;  %v585_v57 = vmul.f32 0.2, %v477_v45  ;;  %vm542_vm9 = vcmp.ge.f32.partialorder %v434_v50, 0.0  ;;  %v574_v58 = vmul.f32 0.2, %v434_v50 }
  0xe8   : > { %1040 = vst [vmem:[%s1259_s4 + $0x8] sm:$0xff] %v968_v52   ;;  %1048 = vst [vmem:[%s1259_s4 + $0x48] sm:$0xff] %v1008_v53   ;;  %v601_v60 = vsel %vm537_vm7, %v413_v44, %v569_v54  ;;  %v590_v61 = vmul.f32 0.2, %v498_v51  ;;  %v426_v62 = vadd.f32 %v1244_v20, %v425_v55  ;;  %v1090_v63 = vpop.f32.mrf.mxu0  ;;  %v1106_v0 = vpop.f32.mrf.mxu1  ;;  %vm558_vm10 = vcmp.ge.f32.partialorder %v498_v51, 0.0 }
  0xe9   : > { %v963_v1 = vpack.c.bf16 %v601_v60, %v600_v42  ;;  %v617_v2 = vsel %vm553_vm8, %v477_v45, %v585_v57  ;;  %v490_v3 = vadd.f32 %v1244_v20, %v489_v56  ;;  %v606_v5 = vsel %vm542_vm9, %v434_v50, %v574_v58 }
  0xea   : > { %v1003_v4 = vpack.c.bf16 %v617_v2, %v616_v59  ;;  %vm540_vm11 = vcmp.ge.f32.partialorder %v426_v62, 0.0  ;;  %v572_v6 = vmul.f32 0.2, %v426_v62  ;;  %v428_v7 = vpop.f32.mrf.mxu0  ;;  %v492_v8 = vpop.f32.mrf.mxu1  ;;  %v437_v10 = vadd.f32 %v1090_v63, %v1244_v20 }
  0xeb   : > { %964 = vst [vmem:[%s1259_s4] sm:$0xff] %v963_v1   ;;  %vm556_vm12 = vcmp.ge.f32.partialorder %v490_v3, 0.0  ;;  %v588_v9 = vmul.f32 0.2, %v490_v3  ;;  %v501_v11 = vadd.f32 %v1106_v0, %v1244_v20  ;;  %v622_v12 = vsel %vm558_vm10, %v498_v51, %v590_v61 }
  0xec   : > { %1047 = vst [vmem:[%s1259_s4 + $0x40] sm:$0xff] %v1003_v4   ;;  %v604_v13 = vsel %vm540_vm11, %v426_v62, %v572_v6  ;;  %v429_v14 = vadd.f32 %v1244_v20, %v428_v7  ;;  %v493_v15 = vadd.f32 %v1244_v20, %v492_v8  ;;  %v1093_v16 = vpop.f32.mrf.mxu0  ;;  %v1109_v17 = vpop.f32.mrf.mxu1  ;;  %vm543_vm13 = vcmp.ge.f32.partialorder %v437_v10, 0.0 }
  0xed   : > { %v620_v18 = vsel %vm556_vm12, %v490_v3, %v588_v9  ;;  %v575_v19 = vmul.f32 0.2, %v437_v10  ;;  %vm559_vm14 = vcmp.ge.f32.partialorder %v501_v11, 0.0  ;;  %v591_v21 = vmul.f32 0.2, %v501_v11 }
  0xee   : > { %vm541_vm15 = vcmp.ge.f32.partialorder %v429_v14, 0.0  ;;  %v573_v22 = vmul.f32 0.2, %v429_v14  ;;  %vm557_vm0 = vcmp.ge.f32.partialorder %v493_v15, 0.0  ;;  %v441_v23 = vpop.f32.mrf.mxu0  ;;  %v505_v24 = vpop.f32.mrf.mxu1  ;;  %v589_v26 = vmul.f32 0.2, %v493_v15 }
  0xef   : > { %v607_v25 = vsel %vm543_vm13, %v437_v10, %v575_v19  ;;  %v450_v27 = vadd.f32 %v1093_v16, %v1244_v20  ;;  %v514_v28 = vadd.f32 %v1109_v17, %v1244_v20  ;;  %v623_v30 = vsel %vm559_vm14, %v501_v11, %v591_v21 }
  0xf0   : > { %v978_v29 = vpack.c.bf16 %v607_v25, %v606_v5  ;;  %v605_v31 = vsel %vm541_vm15, %v429_v14, %v573_v22  ;;  %v442_v32 = vadd.f32 %v1244_v20, %v441_v23  ;;  %v1094_v33 = vpop.f32.mrf.mxu0  ;;  %v1110_v34 = vpop.f32.mrf.mxu1  ;;  %v1018_v35 = vpack.c.bf16 %v623_v30, %v622_v12 }
  0xf1   : > { %v973_v36 = vpack.c.bf16 %v605_v31, %v604_v13  ;;  %v621_v37 = vsel %vm557_vm0, %v493_v15, %v589_v26  ;;  %vm546_vm1 = vcmp.ge.f32.partialorder %v450_v27, 0.0  ;;  %v578_v39 = vmul.f32 0.2, %v450_v27 }
  0xf2   : > { %1042 = vst [vmem:[%s1259_s4 + $0x18] sm:$0xff] %v978_v29   ;;  %v1013_v38 = vpack.c.bf16 %v621_v37, %v620_v18  ;;  %vm562_vm2 = vcmp.ge.f32.partialorder %v514_v28, 0.0  ;;  %v594_v40 = vmul.f32 0.2, %v514_v28  ;;  %v444_v41 = vpop.f32.mrf.mxu0  ;;  %v508_v42 = vpop.f32.mrf.mxu1  ;;  %1050 = vst [vmem:[%s1259_s4 + $0x58] sm:$0xff] %v1018_v35   ;;  %vm544_vm3 = vcmp.ge.f32.partialorder %v442_v32, 0.0 }
  0xf3   : > { %1041 = vst [vmem:[%s1259_s4 + $0x10] sm:$0xff] %v973_v36   ;;  %v576_v43 = vmul.f32 0.2, %v442_v32  ;;  %v506_v44 = vadd.f32 %v1244_v20, %v505_v24  ;;  %v453_v45 = vadd.f32 %v1094_v33, %v1244_v20  ;;  %v610_v46 = vsel %vm546_vm1, %v450_v27, %v578_v39 }
  0xf4   : > { %1049 = vst [vmem:[%s1259_s4 + $0x50] sm:$0xff] %v1013_v38   ;;  %v517_v47 = vadd.f32 %v1110_v34, %v1244_v20  ;;  %v445_v48 = vadd.f32 %v1244_v20, %v444_v41  ;;  %v1097_v49 = vpop.f32.mrf.mxu0  ;;  %v1113_v50 = vpop.f32.mrf.mxu1  ;;  %v626_v51 = vsel %vm562_vm2, %v514_v28, %v594_v40  ;;  %v509_v59 = vadd.f32 %v1244_v20, %v508_v42 }
  0xf5   : > { %v608_v52 = vsel %vm544_vm3, %v442_v32, %v576_v43  ;;  %vm560_vm4 = vcmp.ge.f32.partialorder %v506_v44, 0.0  ;;  %vm547_vm5 = vcmp.ge.f32.partialorder %v453_v45, 0.0  ;;  %v579_v53 = vmul.f32 0.2, %v453_v45 }
  0xf6   : > { %vm563_vm6 = vcmp.ge.f32.partialorder %v517_v47, 0.0  ;;  %v595_v54 = vmul.f32 0.2, %v517_v47  ;;  %vm545_vm7 = vcmp.ge.f32.partialorder %v445_v48, 0.0  ;;  %v457_v55 = vpop.f32.mrf.mxu0  ;;  %v521_v56 = vpop.f32.mrf.mxu1  ;;  %v592_v57 = vmul.f32 0.2, %v506_v44 }
  0xf7   : > { %v577_v58 = vmul.f32 0.2, %v445_v48  ;;  %v466_v60 = vadd.f32 %v1097_v49, %v1244_v20  ;;  %v611_v61 = vsel %vm547_vm5, %v453_v45, %v579_v53  ;;  %v530_v63 = vadd.f32 %v1113_v50, %v1244_v20 }
  0xf8   : > { %v627_v62 = vsel %vm563_vm6, %v517_v47, %v595_v54  ;;  %v458_v0 = vadd.f32 %v1244_v20, %v457_v55  ;;  %v1098_v1 = vpop.f32.mrf.mxu0  ;;  %v1114_v2 = vpop.f32.mrf.mxu1  ;;  %v988_v3 = vpack.c.bf16 %v611_v61, %v610_v46  ;;  %vm561_vm8 = vcmp.ge.f32.partialorder %v509_v59, 0.0 }
  0xf9   : > { %v1028_v4 = vpack.c.bf16 %v627_v62, %v626_v51  ;;  %v609_v5 = vsel %vm545_vm7, %v445_v48, %v577_v58  ;;  %v593_v7 = vmul.f32 0.2, %v509_v59  ;;  %v582_v8 = vmul.f32 0.2, %v466_v60 }
  0xfa   : > { %v983_v6 = vpack.c.bf16 %v609_v5, %v608_v52  ;;  %v624_v9 = vsel %vm560_vm4, %v506_v44, %v592_v57  ;;  %1044 = vst [vmem:[%s1259_s4 + $0x28] sm:$0xff] %v988_v3   ;;  %vm550_vm9 = vcmp.ge.f32.partialorder %v466_v60, 0.0  ;;  %v598_v11 = vmul.f32 0.2, %v530_v63  ;;  %v460_v14 = vpop.f32.mrf.mxu0  ;;  %v524_v15 = vpop.f32.mrf.mxu1 }
  0xfb   : > { %1052 = vst [vmem:[%s1259_s4 + $0x68] sm:$0xff] %v1028_v4   ;;  %v625_v10 = vsel %vm561_vm8, %v509_v59, %v593_v7  ;;  %v522_v12 = vadd.f32 %v1244_v20, %v521_v56  ;;  %v469_v13 = vadd.f32 %v1098_v1, %v1244_v20  ;;  %vm566_vm10 = vcmp.ge.f32.partialorder %v530_v63, 0.0 }
  0xfc   : > { %1043 = vst [vmem:[%s1259_s4 + $0x20] sm:$0xff] %v983_v6   ;;  %v1023_v16 = vpack.c.bf16 %v625_v10, %v624_v9  ;;  %vm548_vm11 = vcmp.ge.f32.partialorder %v458_v0, 0.0  ;;  %v533_v17 = vadd.f32 %v1114_v2, %v1244_v20  ;;  %v614_v18 = vsel %vm550_vm9, %v466_v60, %v582_v8 }
  0xfd   : > { %v580_v19 = vmul.f32 0.2, %v458_v0  ;;  %vm551_vm12 = vcmp.ge.f32.partialorder %v469_v13, 0.0  ;;  %v583_v21 = vmul.f32 0.2, %v469_v13  ;;  %v461_v23 = vadd.f32 %v1244_v20, %v460_v14 }
  0xfe   : > { %1051 = vst [vmem:[%s1259_s4 + $0x60] sm:$0xff] %v1023_v16   ;;  %vm567_vm13 = vcmp.ge.f32.partialorder %v533_v17, 0.0  ;;  %v599_v22 = vmul.f32 0.2, %v533_v17  ;;  %v525_v24 = vadd.f32 %v1244_v20, %v524_v15  ;;  %v630_v25 = vsel %vm566_vm10, %v530_v63, %v598_v11 }
  0xff   : > { %vm564_vm14 = vcmp.ge.f32.partialorder %v522_v12, 0.0  ;;  %v596_v26 = vmul.f32 0.2, %v522_v12  ;;  %v615_v27 = vsel %vm551_vm12, %v469_v13, %v583_v21  ;;  %vm549_vm15 = vcmp.ge.f32.partialorder %v461_v23, 0.0 }
 0x100   : > { %v998_v28 = vpack.c.bf16 %v615_v27, %v614_v18  ;;  %v631_v29 = vsel %vm567_vm13, %v533_v17, %v599_v22  ;;  %v581_v30 = vmul.f32 0.2, %v461_v23  ;;  %vm565_vm0 = vcmp.ge.f32.partialorder %v525_v24, 0.0 }
 0x101   : > { %v1038_v31 = vpack.c.bf16 %v631_v29, %v630_v25  ;;  %v597_v32 = vmul.f32 0.2, %v525_v24  ;;  %v612_v33 = vsel %vm548_vm11, %v458_v0, %v580_v19  ;;  %v628_v35 = vsel %vm564_vm14, %v522_v12, %v596_v26 }
 0x102   : > { %1046 = vst [vmem:[%s1259_s4 + $0x38] sm:$0xff] %v998_v28   ;;  %v613_v34 = vsel %vm549_vm15, %v461_v23, %v581_v30 }
 0x103   : > { %1054 = vst [vmem:[%s1259_s4 + $0x78] sm:$0xff] %v1038_v31   ;;  %v993_v20 = vpack.c.bf16 %v613_v34, %v612_v33  ;;  %v629_v36 = vsel %vm565_vm0, %v525_v24, %v597_v32 }
 0x104   : > { %v1033_v37 = vpack.c.bf16 %v629_v36, %v628_v35 }
 0x105   : > { %1045 = vst [vmem:[%s1259_s4 + $0x30] sm:$0xff] %v993_v20  }
 0x106   : > { %1053 = vst [vmem:[%s1259_s4 + $0x70] sm:$0xff] %v1033_v37  }
 0x107 PF: > { %s13_s12 = sadd.s32 1, %s1157_s12  }
 0x108   : > { %p10_p4 = scmp.ge.s32.totalorder %s13_s12, 4  }
 0x10a   :  { %12 = sbr.rel (!%p10_p4) target bundleno = 1 (0x1), region = 62 }

// kernel: discriminator_forward.7
= control target key start
LH: loop header
LB: loop body
LE: loop exit
PB: predicated region body
PF: predicated region fallthrough
CT: control target
= control target key end

     0   :  { %s420_s12 = smov 0   ;;  %s447_s0 = inlined_call_operand.vmem [shape: f32[128,128], index: 0, kind: input, shape index: {}]   ;;  %s448_s1 = inlined_call_operand.vmem [shape: f32[1,128], index: 1, kind: input, shape index: {}]   ;;  %s449_s2 = inlined_call_operand.vmem [shape: f32[1,128], index: 2, kind: input, shape index: {}]   ;;  %s450_s3 = inlined_call_operand.vmem [shape: bf16[128,128], index: 3, kind: output, shape index: {}]  }
   0x1 LB: > { %s332_s13 = sadd.s32 4294967295, %s398_s12   ;;  %p336_p0 = scmp.ge.s32.totalorder %s398_s12, 1  ;;  %s398_s12 = sphi %s420_s12, %s13_s12  }
   0x2   : > { %p138_p1 = scmp.lt.s32.totalorder %s398_s12, 3 }
   0x4   : > { %p139_p2 = pnand %p336_p0, %p138_p1 }
   0x5   : > { %s337_s14 = sshll.u32 (!%p139_p2), %s332_s13, 3 }
   0x6   : > { %142 = sbr.rel (%p139_p2) target bundleno = 32 (0x20), region = 32  ;;  %p163_p3 = scmp.lt.s32.totalorder (!%p139_p2), %s337_s14, 15 }
   0xb   : > { %s452_s14 = smov (!%p163_p3, %s337_s14), 15  ;;  %v341_v0 = vld [vmem:[%s448_s1] ss:$0 sm:$0xff] }
   0xc   : > { %s338_s15 = sshll.u32 %s452_s14, 3  ;;  %v342_v1 = vld [vmem:[%s449_s2] ss:$0 sm:$0xff]  ;;  %s340_s23 = sshll.u32 %s452_s14, 2 }
   0xd   : > { %s166_s20 = scalar_lea.vmem %s447_s0, %s338_s15  ;;  %s172_s26 = scalar_lea.vmem %s450_s3, %s340_s23 }
   0xe   : > { %v174_v2 = vld [vmem:[%s166_s20] sm:$0xff]  ;;  %v175_v3 = vld [vmem:[%s166_s20 + $0x8] sm:$0xff]  ;;  %v176_v4 = vld [vmem:[%s166_s20 + $0x10] sm:$0xff] }
   0xf   : > { %v189_v5 = vmul.f32 %v341_v0, %v174_v2  ;;  %v190_v6 = vmul.f32 %v341_v0, %v175_v3  ;;  %v177_v7 = vld [vmem:[%s166_s20 + $0x18] sm:$0xff]  ;;  %v191_v8 = vmul.f32 %v341_v0, %v176_v4  ;;  %v178_v9 = vld [vmem:[%s166_s20 + $0x20] sm:$0xff]  ;;  %v179_v10 = vld [vmem:[%s166_s20 + $0x28] sm:$0xff] }
  0x10   : > { %v192_v11 = vmul.f32 %v341_v0, %v177_v7  ;;  %v193_v12 = vmul.f32 %v341_v0, %v178_v9  ;;  %v194_v13 = vmul.f32 %v341_v0, %v179_v10  ;;  %v180_v14 = vld [vmem:[%s166_s20 + $0x30] sm:$0xff]  ;;  %v181_v15 = vld [vmem:[%s166_s20 + $0x38] sm:$0xff] }
  0x11   : > { %v204_v16 = vadd.f32 %v342_v1, %v189_v5  ;;  %v205_v17 = vadd.f32 %v342_v1, %v190_v6  ;;  %v206_v18 = vadd.f32 %v342_v1, %v191_v8  ;;  %v195_v19 = vmul.f32 %v341_v0, %v180_v14 }
  0x12   : > { %v207_v20 = vadd.f32 %v342_v1, %v192_v11  ;;  %v208_v21 = vadd.f32 %v342_v1, %v193_v12  ;;  %v209_v22 = vadd.f32 %v342_v1, %v194_v13  ;;  %v196_v23 = vmul.f32 %v341_v0, %v181_v15 }
  0x13   : > { %vm212_vm0 = vcmp.ge.f32.partialorder %v204_v16, 0.0  ;;  %vm213_vm1 = vcmp.ge.f32.partialorder %v205_v17, 0.0  ;;  %v220_v24 = vmul.f32 0.2, %v204_v16  ;;  %v221_v25 = vmul.f32 0.2, %v205_v17 }
  0x14   : > { %vm214_vm2 = vcmp.ge.f32.partialorder %v206_v18, 0.0  ;;  %vm215_vm3 = vcmp.ge.f32.partialorder %v207_v20, 0.0  ;;  %v222_v26 = vmul.f32 0.2, %v206_v18  ;;  %v223_v27 = vmul.f32 0.2, %v207_v20 }
  0x15   : > { %v228_v28 = vsel %vm212_vm0, %v204_v16, %v220_v24  ;;  %v229_v29 = vsel %vm213_vm1, %v205_v17, %v221_v25  ;;  %vm216_vm4 = vcmp.ge.f32.partialorder %v208_v21, 0.0  ;;  %vm217_vm5 = vcmp.ge.f32.partialorder %v209_v22, 0.0 }
  0x16   : > { %v364_v30 = vpack.c.bf16 %v229_v29, %v228_v28  ;;  %v230_v31 = vsel %vm214_vm2, %v206_v18, %v222_v26  ;;  %v231_v32 = vsel %vm215_vm3, %v207_v20, %v223_v27  ;;  %v224_v33 = vmul.f32 0.2, %v208_v21 }
  0x17   : > { %v369_v34 = vpack.c.bf16 %v231_v32, %v230_v31  ;;  %v225_v35 = vmul.f32 0.2, %v209_v22  ;;  %v210_v36 = vadd.f32 %v342_v1, %v195_v19  ;;  %v211_v37 = vadd.f32 %v342_v1, %v196_v23 }
  0x18   : > { %365 = vst [vmem:[%s172_s26] sm:$0xff] %v364_v30   ;;  %v232_v38 = vsel %vm216_vm4, %v208_v21, %v224_v33 }
  0x19   : > { %381 = vst [vmem:[%s172_s26 + $0x8] sm:$0xff] %v369_v34   ;;  %v233_v39 = vsel %vm217_vm5, %v209_v22, %v225_v35  ;;  %vm218_vm6 = vcmp.ge.f32.partialorder %v210_v36, 0.0  ;;  %vm219_vm7 = vcmp.ge.f32.partialorder %v211_v37, 0.0  ;;  %v226_v40 = vmul.f32 0.2, %v210_v36 }
  0x1a   : > { %v374_v41 = vpack.c.bf16 %v233_v39, %v232_v38  ;;  %v227_v42 = vmul.f32 0.2, %v211_v37 }
  0x1b   : > { %v234_v43 = vsel %vm218_vm6, %v210_v36, %v226_v40 }
  0x1c   : > { %382 = vst [vmem:[%s172_s26 + $0x10] sm:$0xff] %v374_v41   ;;  %v235_v44 = vsel %vm219_vm7, %v211_v37, %v227_v42 }
  0x1d   : > { %v379_v45 = vpack.c.bf16 %v235_v44, %v234_v43 }
  0x1f   : > { %383 = vst [vmem:[%s172_s26 + $0x18] sm:$0xff] %v379_v45  }
  0x20 PF: > { %s13_s12 = sadd.s32 1, %s398_s12  }
  0x21   : > { %p10_p4 = scmp.ge.s32.totalorder %s13_s12, 4  }
  0x23   :  { %12 = sbr.rel (!%p10_p4) target bundleno = 1 (0x1), region = 62 }

// kernel: discriminator_forward.6
= control target key start
LH: loop header
LB: loop body
LE: loop exit
PB: predicated region body
PF: predicated region fallthrough
CT: control target
= control target key end

     0   :  { %s760_s15 = smov 0   ;;  %s863_s0 = inlined_call_operand.vmem [shape: bf16[128,256], index: 0, kind: input, shape index: {}]   ;;  %s864_s1 = inlined_call_operand.vmem [shape: bf16[256,128], index: 1, kind: input, shape index: {}]   ;;  %s865_s2 = inlined_call_operand.vmem [shape: f32[1,128], index: 2, kind: input, shape index: {}]   ;;  %s866_s3 = inlined_call_operand.vmem [shape: f32[128,128], index: 3, kind: output, shape index: {0}]   ;;  %s867_s4 = inlined_call_operand.vmem [shape: f32[2,2,128], index: 4, kind: output, shape index: {1}]  }
   0x1 LB: > { %s766_s16 = sadd.s32 4294967295, %s733_s15   ;;  %p600_p0 = scmp.ge.s32.totalorder %s733_s15, 1  ;;  %s733_s15 = sphi %s760_s15, %s15_s15  }
   0x2   : > { %p167_p1 = scmp.lt.s32.totalorder %s733_s15, 3 }
   0x4   : > { %p168_p2 = pnand %p600_p0, %p167_p1 }
   0x5   : > { %s601_s19 = sshll.u32 (!%p168_p2), %s766_s16, 3  ;;  %p211_p4 = scmp.lt.s32.totalorder (!%p168_p2), %s766_s16, 1 }
   0x6   : > { %171 = sbr.rel (%p168_p2) target bundleno = 281 (0x119), region = 32  ;;  %p199_p3 = scmp.lt.s32.totalorder (!%p168_p2), %s601_s19, 15 }
   0xb   : > { %v699_v0 = vld [vmem:[%s864_s1 + $0x78] sm:$0xff]   ;;  %v701_v2 = vld [vmem:[%s864_s1 + $0x70] sm:$0xff]   ;;  %v703_v4 = vld [vmem:[%s864_s1 + $0x68] sm:$0xff]   ;;  %s869_s19 = smov (!%p199_p3, %s601_s19), 15  ;;  %s871_s16 = smov (!%p211_p4, %s766_s16), 1  ;;  %vm498_vm0 = vcmask 1040384  }
   0xc   : > { %v700_v1 = vld [vmem:[%s864_s1 + $0x38] sm:$0xff]   ;;  %635 = vmatprep.subr.bf16.mxu0 %v699_v0  ;;  %675 = vmatprep.subr.bf16.mxu1 %v699_v0  ;;  %v702_v3 = vld [vmem:[%s864_s1 + $0x30] sm:$0xff]   ;;  %v704_v5 = vld [vmem:[%s864_s1 + $0x28] sm:$0xff]   ;;  %s634_s8 = sshll.u32 %s869_s19, 3  ;;  %s606_s19 = sshll.u32 %s871_s16, 1 }
   0xd   : > { %636 = vmatpush3.bf16.msra.mxu0 %v700_v1  ;;  %683 = vmatpush3.bf16.msra.mxu1 %v700_v1  ;;  %v705_v6 = vld [vmem:[%s864_s1 + $0x60] sm:$0xff]   ;;  %v707_v8 = vld [vmem:[%s864_s1 + $0x58] sm:$0xff]   ;;  %s806_s13 = scalar_lea.vmem %s863_s0, %s634_s8  ;;  %v709_v10 = vld [vmem:[%s864_s1 + $0x50] sm:$0xff]   ;;  %s845_s10 = scalar_lea.vmem %s866_s3, %s634_s8 }
   0xe   : > { %637 = vmatprep.subr.bf16.mxu0 %v701_v2  ;;  %676 = vmatprep.subr.bf16.mxu1 %v701_v2  ;;  %v706_v7 = vld [vmem:[%s864_s1 + $0x20] sm:$0xff]   ;;  %v708_v9 = vld [vmem:[%s864_s1 + $0x18] sm:$0xff]   ;;  %v710_v13 = vld [vmem:[%s864_s1 + $0x10] sm:$0xff]   ;;  %s214_s12 = scalar_lea.vmem %s867_s4, %s606_s19 }
   0xf   : > { %v717_v11 = vld [vmem:[%s806_s13 + $0x4] ss:$8 sps:$4 sm:$0xff]   ;;  %v715_v18 = vld [vmem:[%s806_s13] ss:$8 sps:$4 sm:$0xff]   ;;  %v721_v20 = vld [vmem:[%s806_s13 + $0x14] ss:$8 sps:$4 sm:$0xff]  }
  0x10   : > { %v720_v12 = vld [vmem:[%s806_s13 + $0x24] ss:$8 sps:$4 sm:$0xff]   ;;  %431 = vmatprep.mubr.bf16.mxu0 %v717_v11  ;;  %v718_v19 = vld [vmem:[%s806_s13 + $0x20] ss:$8 sps:$4 sm:$0xff]   ;;  %v724_v21 = vld [vmem:[%s806_s13 + $0x34] ss:$8 sps:$4 sm:$0xff]  }
  0x11   : > { %638 = vmatpush3.bf16.msra.mxu0 %v702_v3  ;;  %684 = vmatpush3.bf16.msra.mxu1 %v702_v3  ;;  %v711_v14 = vld [vmem:[%s864_s1 + $0x48] sm:$0xff]   ;;  %v713_v16 = vld [vmem:[%s864_s1 + $0x40] sm:$0xff]   ;;  %v723_v22 = vld [vmem:[%s806_s13 + $0x10] ss:$8 sps:$4 sm:$0xff]  }
  0x12   : > { %639 = vmatprep.subr.bf16.mxu0 %v703_v4  ;;  %677 = vmatprep.subr.bf16.mxu1 %v703_v4  ;;  %v712_v15 = vld [vmem:[%s864_s1 + $0x8] sm:$0xff]   ;;  %v714_v17 = vld [vmem:[%s864_s1] sm:$0xff]   ;;  %v726_v23 = vld [vmem:[%s806_s13 + $0x30] ss:$8 sps:$4 sm:$0xff]  }
  0x13   : > { %447 = vmatprep.mubr.bf16.mxu1 %v720_v12  ;;  %v607_v26 = vld [vmem:[%s865_s2] ss:$0 sm:$0xff] }
  0x15   : > { %640 = vmatpush3.bf16.msra.mxu0 %v704_v5  ;;  %685 = vmatpush3.bf16.msra.mxu1 %v704_v5 }
  0x16   : > { %641 = vmatprep.subr.bf16.mxu0 %v705_v6  ;;  %678 = vmatprep.subr.bf16.mxu1 %v705_v6 }
  0x19   : > { %642 = vmatpush3.bf16.msra.mxu0 %v706_v7  ;;  %686 = vmatpush3.bf16.msra.mxu1 %v706_v7 }
  0x1a   : > { %643 = vmatprep.subr.bf16.mxu0 %v707_v8  ;;  %679 = vmatprep.subr.bf16.mxu1 %v707_v8 }
  0x1d   : > { %644 = vmatpush3.bf16.msra.mxu0 %v708_v9  ;;  %687 = vmatpush3.bf16.msra.mxu1 %v708_v9 }
  0x1e   : > { %645 = vmatprep.subr.bf16.mxu0 %v709_v10  ;;  %680 = vmatprep.subr.bf16.mxu1 %v709_v10 }
  0x21   : > { %646 = vmatpush3.bf16.msra.mxu0 %v710_v13  ;;  %688 = vmatpush3.bf16.msra.mxu1 %v710_v13 }
  0x22   : > { %647 = vmatprep.subr.bf16.mxu0 %v711_v14  ;;  %681 = vmatprep.subr.bf16.mxu1 %v711_v14 }
  0x25   : > { %648 = vmatpush3.bf16.msra.mxu0 %v712_v15  ;;  %689 = vmatpush3.bf16.msra.mxu1 %v712_v15 }
  0x26   : > { %649 = vmatprep.subr.bf16.mxu0 %v713_v16  ;;  %682 = vmatprep.subr.bf16.mxu1 %v713_v16 }
  0x29   : > { %650 = vmatpush3.bf16.msra.mxu0 %v714_v17  ;;  %690 = vmatpush3.bf16.msra.mxu1 %v714_v17 }
  0x2c   : > { %432 = vmatmul.mubr.bf16.vlgmr.msra.gmra.mxu0 %v715_v18  ;;  %448 = vmatmul.mubr.bf16.vlgmr.msra.gmra.mxu1 %v718_v19 }
  0x2d   : > { %439 = vmatprep.mubr.bf16.mxu0 %v721_v20  ;;  %455 = vmatprep.mubr.bf16.mxu1 %v724_v21 }
  0x34   : > { %440 = vmatmul.mubr.bf16.gmra.mxu0 %v723_v22  ;;  %456 = vmatmul.mubr.bf16.gmra.mxu1 %v726_v23 }
  0xec   : > { %v651_v24 = vpop.f32.mrf.mxu0  ;;  %v663_v25 = vpop.f32.mrf.mxu1 }
  0xee   : > { %v652_v27 = vpop.f32.mrf.mxu0  ;;  %v664_v28 = vpop.f32.mrf.mxu1 }
  0xef   : > { %v653_v29 = vadd.f32 %v652_v27, %v651_v24  ;;  %v665_v30 = vadd.f32 %v664_v28, %v663_v25 }
  0xf0   : > { %v654_v31 = vpop.f32.mrf.mxu0  ;;  %v666_v32 = vpop.f32.mrf.mxu1 }
  0xf1   : > { %v434_v33 = vadd.f32 %v653_v29, %v607_v26  ;;  %v450_v34 = vadd.f32 %v665_v30, %v607_v26 }
  0xf2   : > { %v655_v35 = vpop.f32.mrf.mxu0  ;;  %v667_v36 = vpop.f32.mrf.mxu1 }
  0xf3   : > { %501 = vst [vmem:[%s845_s10] sm:$0xff] %v434_v33  ;;  %505 = vst [vmem:[%s845_s10 + $0x20] sm:$0xff] %v450_v34  ;;  %v656_v37 = vadd.f32 %v655_v35, %v654_v31  ;;  %v668_v38 = vadd.f32 %v667_v36, %v666_v32  ;;  %v477_v51 = vmul.f32 %v434_v33, %v434_v33 }
  0xf4   : > { %v657_v39 = vpop.f32.mrf.mxu0  ;;  %v669_v40 = vpop.f32.mrf.mxu1  ;;  %v481_v2 = vmul.f32 %v450_v34, %v450_v34 }
  0xf5   : > { %v437_v41 = vadd.f32 %v656_v37, %v607_v26  ;;  %v453_v42 = vadd.f32 %v668_v38, %v607_v26 }
  0xf6   : > { %v658_v43 = vpop.f32.mrf.mxu0  ;;  %v670_v44 = vpop.f32.mrf.mxu1 }
  0xf7   : > { %502 = vst [vmem:[%s845_s10 + $0x8] sm:$0xff] %v437_v41  ;;  %506 = vst [vmem:[%s845_s10 + $0x28] sm:$0xff] %v453_v42  ;;  %v659_v45 = vadd.f32 %v658_v43, %v657_v39  ;;  %v671_v47 = vadd.f32 %v670_v44, %v669_v40  ;;  %v478_v49 = vmul.f32 %v437_v41, %v437_v41 }
  0xf8   : > { %v660_v46 = vpop.f32.mrf.mxu0  ;;  %v672_v48 = vpop.f32.mrf.mxu1  ;;  %v464_v55 = vadd.f32 %v437_v41, %v434_v33  ;;  %v482_v5 = vmul.f32 %v453_v42, %v453_v42 }
  0xf9   : > { %v442_v50 = vadd.f32 %v659_v45, %v607_v26  ;;  %v458_v52 = vadd.f32 %v671_v47, %v607_v26  ;;  %v485_v59 = vadd.f32 %v478_v49, %v477_v51 }
  0xfa   : > { %v661_v53 = vpop.f32.mrf.mxu0  ;;  %v673_v54 = vpop.f32.mrf.mxu1 }
  0xfb   : > { %v479_v56 = vmul.f32 %v442_v50, %v442_v50  ;;  %503 = vst [vmem:[%s845_s10 + $0x10] sm:$0xff] %v442_v50  ;;  %v662_v57 = vadd.f32 %v661_v53, %v660_v46  ;;  %v674_v58 = vadd.f32 %v673_v54, %v672_v48  ;;  %507 = vst [vmem:[%s845_s10 + $0x30] sm:$0xff] %v458_v52 }
  0xfc   : > { %v465_v60 = vadd.f32 %v464_v55, %v442_v50  ;;  %v483_v8 = vmul.f32 %v458_v52, %v458_v52 }
  0xfd   : > { %v445_v61 = vadd.f32 %v662_v57, %v607_v26  ;;  %v461_v62 = vadd.f32 %v674_v58, %v607_v26  ;;  %v486_v63 = vadd.f32 %v485_v59, %v479_v56 }
  0xff   : > { %v466_v0 = vadd.f32 %v465_v60, %v445_v61  ;;  %v480_v1 = vmul.f32 %v445_v61, %v445_v61  ;;  %504 = vst [vmem:[%s845_s10 + $0x18] sm:$0xff] %v445_v61  ;;  %508 = vst [vmem:[%s845_s10 + $0x38] sm:$0xff] %v461_v62  ;;  %v484_v12 = vmul.f32 %v461_v62, %v461_v62 }
 0x101   : > { %v467_v3 = vadd.f32 %v466_v0, %v450_v34  ;;  %v487_v4 = vadd.f32 %v486_v63, %v480_v1 }
 0x103   : > { %v488_v6 = vadd.f32 %v487_v4, %v481_v2  ;;  %v468_v7 = vadd.f32 %v467_v3, %v453_v42 }
 0x105   : > { %v469_v9 = vadd.f32 %v468_v7, %v458_v52  ;;  %v489_v10 = vadd.f32 %v488_v6, %v482_v5 }
 0x107   : > { %v470_v11 = vadd.f32 %v469_v9, %v461_v62  ;;  %v490_v13 = vadd.f32 %v489_v10, %v483_v8 }
 0x109   : > { %v471_v14 = vrot.slane %v470_v11, 4  ;;  %v491_v15 = vadd.f32 %v490_v13, %v484_v12 }
 0x10b   : > { %v472_v16 = vadd.f32 %v471_v14, %v470_v11  ;;  %v492_v17 = vrot.slane %v491_v15, 4 }
 0x10d   : > { %v473_v18 = vrot.slane %v472_v16, 2  ;;  %v493_v19 = vadd.f32 %v492_v17, %v491_v15 }
 0x10f   : > { %v474_v20 = vadd.f32 %v473_v18, %v472_v16  ;;  %v494_v21 = vrot.slane %v493_v19, 2 }
 0x111   : > { %v475_v22 = vrot.slane %v474_v20, 1  ;;  %v495_v23 = vadd.f32 %v494_v21, %v493_v19 }
 0x113   : > { %v496_v24 = vrot.slane %v495_v23, 1  ;;  %v476_v25 = vadd.f32 %v475_v22, %v474_v20 }
 0x115   : > { %v497_v26 = vadd.f32 %v496_v24, %v495_v23 }
 0x117   : > { %v499_v27 = vsel %vm498_vm0, %v476_v25, %v497_v26 }
 0x118   : > { %500 = vst [vmem:[%s214_s12] sm:$0x3] %v499_v27 }
 0x119 PF: > { %s15_s15 = sadd.s32 1, %s733_s15  }
 0x11a   : > { %p12_p5 = scmp.ge.s32.totalorder %s15_s15, 4  }
 0x11c   :  { %14 = sbr.rel (!%p12_p5) target bundleno = 1 (0x1), region = 74 }

// kernel: discriminator_forward.9
= control target key start
LH: loop header
LB: loop body
LE: loop exit
PB: predicated region body
PF: predicated region fallthrough
CT: control target
= control target key end

     0   :  { %s324_s12 = smov 0   ;;  %s347_s0 = inlined_call_operand.vmem [shape: f32[32,128], index: 0, kind: input, shape index: {}]   ;;  %s348_s1 = inlined_call_operand.vmem [shape: f32[1,128], index: 1, kind: input, shape index: {}]   ;;  %s349_s2 = inlined_call_operand.vmem [shape: f32[1,128], index: 2, kind: input, shape index: {}]   ;;  %s350_s3 = inlined_call_operand.vmem [shape: bf16[32,128], index: 3, kind: output, shape index: {}]  }
   0x1 LB: > { %s266_s13 = sadd.s32 4294967295, %s302_s12   ;;  %p270_p0 = scmp.ge.s32.totalorder %s302_s12, 1  ;;  %s302_s12 = sphi %s324_s12, %s13_s12  }
   0x2   : > { %p138_p1 = scmp.lt.s32.totalorder %s302_s12, 3 }
   0x4   : > { %p139_p2 = pnand %p270_p0, %p138_p1 }
   0x5   : > { %s271_s14 = sshll.u32 (!%p139_p2), %s266_s13, 1 }
   0x6   : > { %142 = sbr.rel (%p139_p2) target bundleno = 25 (0x19), region = 32  ;;  %p163_p3 = scmp.lt.s32.totalorder (!%p139_p2), %s271_s14, 3 }
   0xb   : > { %s352_s14 = smov (!%p163_p3, %s271_s14), 3  ;;  %v275_v0 = vld [vmem:[%s348_s1] ss:$0 sm:$0xff] }
   0xc   : > { %s272_s15 = sshll.u32 %s352_s14, 3  ;;  %v276_v3 = vld [vmem:[%s349_s2] ss:$0 sm:$0xff]  ;;  %s274_s23 = sshll.u32 %s352_s14, 2 }
   0xd   : > { %s166_s20 = scalar_lea.vmem %s347_s0, %s272_s15  ;;  %s172_s26 = scalar_lea.vmem %s350_s3, %s274_s23 }
   0xe   : > { %v174_v1 = vld [vmem:[%s166_s20] sm:$0xff]  ;;  %v175_v2 = vld [vmem:[%s166_s20 + $0x8] sm:$0xff] }
   0xf   : > { %v183_v4 = vmul.f32 %v275_v0, %v174_v1  ;;  %v184_v5 = vmul.f32 %v275_v0, %v175_v2 }
  0x11   : > { %v192_v6 = vadd.f32 %v276_v3, %v183_v4  ;;  %v193_v7 = vadd.f32 %v276_v3, %v184_v5 }
  0x13   : > { %vm194_vm0 = vcmp.ge.f32.partialorder %v192_v6, 0.0  ;;  %vm195_vm1 = vcmp.ge.f32.partialorder %v193_v7, 0.0  ;;  %v196_v8 = vmul.f32 0.2, %v192_v6  ;;  %v197_v9 = vmul.f32 0.2, %v193_v7 }
  0x15   : > { %v198_v10 = vsel %vm194_vm0, %v192_v6, %v196_v8  ;;  %v199_v11 = vsel %vm195_vm1, %v193_v7, %v197_v9 }
  0x16   : > { %v286_v12 = vpack.c.bf16 %v199_v11, %v198_v10 }
  0x18   : > { %287 = vst [vmem:[%s172_s26] sm:$0xff] %v286_v12  }
  0x19 PF: > { %s13_s12 = sadd.s32 1, %s302_s12  }
  0x1a   : > { %p10_p4 = scmp.ge.s32.totalorder %s13_s12, 4  }
  0x1c   :  { %12 = sbr.rel (!%p10_p4) target bundleno = 1 (0x1), region = 62 }

// kernel: discriminator_forward.8
= control target key start
LH: loop header
LB: loop body
LE: loop exit
PB: predicated region body
PF: predicated region fallthrough
CT: control target
= control target key end

     0   :  { %s867_s15 = smov 0   ;;  %s995_s0 = inlined_call_operand.vmem [shape: bf16[32,512], index: 0, kind: input, shape index: {}]   ;;  %s996_s1 = inlined_call_operand.vmem [shape: bf16[512,128], index: 1, kind: input, shape index: {}]   ;;  %s997_s2 = inlined_call_operand.vmem [shape: f32[1,128], index: 2, kind: input, shape index: {}]   ;;  %s998_s3 = inlined_call_operand.vmem [shape: f32[32,128], index: 3, kind: output, shape index: {0}]   ;;  %s999_s4 = inlined_call_operand.vmem [shape: f32[2,2,128], index: 4, kind: output, shape index: {1}]  }
   0x1 LB: > { %s873_s16 = sadd.s32 4294967295, %s840_s15   ;;  %p697_p0 = scmp.ge.s32.totalorder %s840_s15, 1  ;;  %s840_s15 = sphi %s867_s15, %s15_s15  }
   0x2   : > { %p167_p1 = scmp.lt.s32.totalorder %s840_s15, 3 }
   0x4   : > { %p168_p2 = pnand %p697_p0, %p167_p1 }
   0x5   : > { %s698_s25 = sshll.u32 (!%p168_p2), %s873_s16, 1  ;;  %p211_p4 = scmp.lt.s32.totalorder (!%p168_p2), %s873_s16, 1 }
   0x6   : > { %171 = sbr.rel (%p168_p2) target bundleno = 268 (0x10c), region = 32  ;;  %p199_p3 = scmp.lt.s32.totalorder (!%p168_p2), %s698_s25, 3 }
   0xb   : > { %v796_v0 = vld [vmem:[%s996_s1 + $0x78] sm:$0xff]   ;;  %v800_v4 = vld [vmem:[%s996_s1 + $0x70] sm:$0xff]   ;;  %v804_v8 = vld [vmem:[%s996_s1 + $0x68] sm:$0xff]   ;;  %s1001_s25 = smov (!%p199_p3, %s698_s25), 3  ;;  %s1003_s16 = smov (!%p211_p4, %s873_s16), 1  ;;  %vm601_vm0 = vcmask 1040384  }
   0xc   : > { %v797_v1 = vld [vmem:[%s996_s1 + $0xf8] sm:$0xff]   ;;  %744 = vmatprep.subr.bf16.mxu0 %v796_v0  ;;  %v801_v5 = vld [vmem:[%s996_s1 + $0xf0] sm:$0xff]   ;;  %v805_v9 = vld [vmem:[%s996_s1 + $0xe8] sm:$0xff]   ;;  %s743_s24 = sshll.u32 %s1001_s25, 4  ;;  %s702_s17 = sshll.u32 %s1001_s25, 3 }
   0xd   : > { %v798_v2 = vld [vmem:[%s996_s1 + $0x38] sm:$0xff]   ;;  %766 = vmatprep.subr.bf16.mxu1 %v797_v1  ;;  %v802_v6 = vld [vmem:[%s996_s1 + $0x30] sm:$0xff]   ;;  %v806_v10 = vld [vmem:[%s996_s1 + $0x28] sm:$0xff]   ;;  %s203_s8 = scalar_lea.vmem %s995_s0, %s743_s24  ;;  %s209_s20 = scalar_lea.vmem %s998_s3, %s702_s17 }
   0xe   : > { %v799_v3 = vld [vmem:[%s996_s1 + $0xb8] sm:$0xff]   ;;  %745 = vmatpush3.bf16.msra.mxu0 %v798_v2  ;;  %v803_v7 = vld [vmem:[%s996_s1 + $0xb0] sm:$0xff]   ;;  %v807_v11 = vld [vmem:[%s996_s1 + $0xa8] sm:$0xff]   ;;  %s703_s25 = sshll.u32 %s1003_s16, 1 }
   0xf   : > { %767 = vmatpush3.bf16.msra.mxu1 %v799_v3  ;;  %746 = vmatprep.subr.bf16.mxu0 %v800_v4  ;;  %v808_v12 = vld [vmem:[%s996_s1 + $0x60] sm:$0xff]   ;;  %v812_v16 = vld [vmem:[%s996_s1 + $0x58] sm:$0xff]   ;;  %v816_v20 = vld [vmem:[%s996_s1 + $0x50] sm:$0xff]   ;;  %s214_s23 = scalar_lea.vmem %s999_s4, %s703_s25 }
  0x10   : > { %768 = vmatprep.subr.bf16.mxu1 %v801_v5  ;;  %v809_v13 = vld [vmem:[%s996_s1 + $0xe0] sm:$0xff]   ;;  %v813_v17 = vld [vmem:[%s996_s1 + $0xd8] sm:$0xff]   ;;  %v817_v21 = vld [vmem:[%s996_s1 + $0xd0] sm:$0xff]  }
  0x11   : > { %v810_v14 = vld [vmem:[%s996_s1 + $0x20] sm:$0xff]   ;;  %v814_v18 = vld [vmem:[%s996_s1 + $0x18] sm:$0xff]   ;;  %v818_v22 = vld [vmem:[%s996_s1 + $0x10] sm:$0xff]  }
  0x12   : > { %747 = vmatpush3.bf16.msra.mxu0 %v802_v6  ;;  %v811_v15 = vld [vmem:[%s996_s1 + $0xa0] sm:$0xff]   ;;  %v815_v19 = vld [vmem:[%s996_s1 + $0x98] sm:$0xff]   ;;  %v819_v23 = vld [vmem:[%s996_s1 + $0x90] sm:$0xff]  }
  0x13   : > { %769 = vmatpush3.bf16.msra.mxu1 %v803_v7  ;;  %748 = vmatprep.subr.bf16.mxu0 %v804_v8  ;;  %v820_v24 = vld [vmem:[%s996_s1 + $0x48] sm:$0xff]   ;;  %v824_v28 = vld [vmem:[%s996_s1 + $0x40] sm:$0xff]  }
  0x14   : > { %770 = vmatprep.subr.bf16.mxu1 %v805_v9  ;;  %v821_v25 = vld [vmem:[%s996_s1 + $0xc8] sm:$0xff]   ;;  %v825_v29 = vld [vmem:[%s996_s1 + $0xc0] sm:$0xff]  }
  0x15   : > { %v822_v26 = vld [vmem:[%s996_s1 + $0x8] sm:$0xff]   ;;  %v826_v30 = vld [vmem:[%s996_s1] sm:$0xff]  }
  0x16   : > { %749 = vmatpush3.bf16.msra.mxu0 %v806_v10  ;;  %v823_v27 = vld [vmem:[%s996_s1 + $0x88] sm:$0xff]   ;;  %v827_v31 = vld [vmem:[%s996_s1 + $0x80] sm:$0xff]  }
  0x17   : > { %771 = vmatpush3.bf16.msra.mxu1 %v807_v11  ;;  %750 = vmatprep.subr.bf16.mxu0 %v808_v12  ;;  %v828_v32 = vld [vmem:[%s203_s8] ss:$16 sps:$4 sm:$0xff]   ;;  %v830_v33 = vld [vmem:[%s203_s8 + $0x4] ss:$16 sps:$4 sm:$0xff]   ;;  %v831_v34 = vld [vmem:[%s203_s8 + $0x8] ss:$16 sps:$4 sm:$0xff]  }
  0x18   : > { %772 = vmatprep.subr.bf16.mxu1 %v809_v13  ;;  %v833_v35 = vld [vmem:[%s203_s8 + $0xc] ss:$16 sps:$4 sm:$0xff]   ;;  %535 = vmatprep.mubr.bf16.mxu0 %v830_v33  ;;  %v704_v38 = vld [vmem:[%s997_s2] ss:$0 sm:$0xff] }
  0x19   : > { %576 = vmatprep.mubr.bf16.mxu1 %v833_v35 }
  0x1a   : > { %751 = vmatpush3.bf16.msra.mxu0 %v810_v14 }
  0x1b   : > { %773 = vmatpush3.bf16.msra.mxu1 %v811_v15  ;;  %752 = vmatprep.subr.bf16.mxu0 %v812_v16 }
  0x1c   : > { %774 = vmatprep.subr.bf16.mxu1 %v813_v17 }
  0x1e   : > { %753 = vmatpush3.bf16.msra.mxu0 %v814_v18 }
  0x1f   : > { %775 = vmatpush3.bf16.msra.mxu1 %v815_v19  ;;  %754 = vmatprep.subr.bf16.mxu0 %v816_v20 }
  0x20   : > { %776 = vmatprep.subr.bf16.mxu1 %v817_v21 }
  0x22   : > { %755 = vmatpush3.bf16.msra.mxu0 %v818_v22 }
  0x23   : > { %777 = vmatpush3.bf16.msra.mxu1 %v819_v23  ;;  %756 = vmatprep.subr.bf16.mxu0 %v820_v24 }
  0x24   : > { %778 = vmatprep.subr.bf16.mxu1 %v821_v25 }
  0x26   : > { %757 = vmatpush3.bf16.msra.mxu0 %v822_v26 }
  0x27   : > { %779 = vmatpush3.bf16.msra.mxu1 %v823_v27  ;;  %758 = vmatprep.subr.bf16.mxu0 %v824_v28 }
  0x28   : > { %780 = vmatprep.subr.bf16.mxu1 %v825_v29 }
  0x2a   : > { %759 = vmatpush3.bf16.msra.mxu0 %v826_v30 }
  0x2b   : > { %781 = vmatpush3.bf16.msra.mxu1 %v827_v31 }
  0x2d   : > { %536 = vmatmul.mubr.bf16.vlgmr.msra.gmra.mxu0 %v828_v32 }
  0x2e   : > { %577 = vmatmul.mubr.bf16.vlgmr.msra.gmra.mxu1 %v831_v34 }
  0xed   : > { %v760_v36 = vpop.f32.mrf.mxu0 }
  0xee   : > { %v782_v37 = vpop.f32.mrf.mxu1 }
  0xef   : > { %v761_v39 = vpop.f32.mrf.mxu0 }
  0xf0   : > { %v762_v40 = vadd.f32 %v761_v39, %v760_v36  ;;  %v783_v41 = vpop.f32.mrf.mxu1 }
  0xf1   : > { %v763_v42 = vpop.f32.mrf.mxu0  ;;  %v784_v44 = vadd.f32 %v783_v41, %v782_v37 }
  0xf2   : > { %v538_v43 = vadd.f32 %v762_v40, %v704_v38  ;;  %v785_v45 = vpop.f32.mrf.mxu1 }
  0xf3   : > { %v764_v46 = vpop.f32.mrf.mxu0 }
  0xf4   : > { %v579_v47 = vadd.f32 %v784_v44, %v538_v43  ;;  %v765_v48 = vadd.f32 %v764_v46, %v763_v42  ;;  %v786_v49 = vpop.f32.mrf.mxu1 }
  0xf5   : > { %v787_v51 = vadd.f32 %v786_v49, %v785_v45 }
  0xf6   : > { %604 = vst [vmem:[%s209_s20] sm:$0xff] %v579_v47  ;;  %v541_v50 = vadd.f32 %v765_v48, %v704_v38  ;;  %v592_v53 = vmul.f32 %v579_v47, %v579_v47 }
  0xf8   : > { %v582_v52 = vadd.f32 %v787_v51, %v541_v50 }
  0xfa   : > { %v585_v54 = vadd.f32 %v582_v52, %v579_v47  ;;  %v593_v55 = vmul.f32 %v582_v52, %v582_v52  ;;  %605 = vst [vmem:[%s209_s20 + $0x8] sm:$0xff] %v582_v52 }
  0xfc   : > { %v586_v56 = vrot.slane %v585_v54, 4  ;;  %v594_v57 = vadd.f32 %v593_v55, %v592_v53 }
  0xfe   : > { %v587_v58 = vadd.f32 %v586_v56, %v585_v54  ;;  %v595_v59 = vrot.slane %v594_v57, 4 }
 0x100   : > { %v588_v60 = vrot.slane %v587_v58, 2  ;;  %v596_v61 = vadd.f32 %v595_v59, %v594_v57 }
 0x102   : > { %v589_v62 = vadd.f32 %v588_v60, %v587_v58  ;;  %v597_v63 = vrot.slane %v596_v61, 2 }
 0x104   : > { %v590_v0 = vrot.slane %v589_v62, 1  ;;  %v598_v1 = vadd.f32 %v597_v63, %v596_v61 }
 0x106   : > { %v599_v2 = vrot.slane %v598_v1, 1  ;;  %v591_v3 = vadd.f32 %v590_v0, %v589_v62 }
 0x108   : > { %v600_v4 = vadd.f32 %v599_v2, %v598_v1 }
 0x10a   : > { %v602_v5 = vsel %vm601_vm0, %v591_v3, %v600_v4 }
 0x10b   : > { %603 = vst [vmem:[%s214_s23] sm:$0x3] %v602_v5 }
 0x10c PF: > { %s15_s15 = sadd.s32 1, %s840_s15  }
 0x10d   : > { %p12_p5 = scmp.ge.s32.totalorder %s15_s15, 4  }
 0x10f   :  { %14 = sbr.rel (!%p12_p5) target bundleno = 1 (0x1), region = 74 }

</bundles_post_ra>
